<compile_context>
chip_gen: v7x
topology: tpu7x:2x2x1
jax: 0.10.0
libtpu: 0.0.40
codegen_flags: <defaults>
</compile_context>

<pallas_src>
import functools

import numpy as np
import jax
import jax.numpy as jnp
from jax import lax
from jax.experimental import pallas as pl
from jax.experimental.pallas import tpu as pltpu

BN_EPS = 1e-5


# ------------------------------ shape helpers ------------------------------ #

def conv2d_size_out(size, kernel_size, stride):
    return (size - (kernel_size - 1) - 1) // stride + 1


def build_fused_gather(N, H, W, C, K, S):
    """Host-side (numpy) index plan for the fused kernel.

    Returns
      idx : (R, K*K*C) int32  gather indices into the NHWC-flattened input that build
            the *duplicated* layer-1 im2col patch matrix.  Rows are ordered
            (layer-2 tap t2) major, (layer-2 spatial s2) middle, (image n) minor,
            R = K*K * OH2*OW2 * N.  With this order:
              - each layer-2 tap block is the contiguous row slab [t2*M2, (t2+1)*M2)
              - each layer-2 output row slab is (spatial-major, image-minor), so the
                layer-3 patch is a lane-concat of contiguous (N, C2) slabs.
      wrow: (1, R) float32  BN1 row weights 1/(N*OH1*OW1 * multiplicity(row)); the
            weighted row-sum of the duplicated conv1 outputs equals the exact batch
            mean over the N*OH1*OW1 unique positions (PyTorch train-mode BN).
    """
    OH1 = conv2d_size_out(H, K, S); OW1 = conv2d_size_out(W, K, S)
    OH2 = conv2d_size_out(OH1, K, S); OW2 = conv2d_size_out(OW1, K, S)
    R = K * K * OH2 * OW2 * N
    idx = np.zeros((R, K * K * C), np.int32)
    row_pos = np.zeros((R, 3), np.int32)
    counts = np.zeros((N, OH1, OW1), np.int64)
    r = 0
    for t2 in range(K * K):                     # layer-2 tap (i2, j2)
        i2, j2 = divmod(t2, K)
        for s2 in range(OH2 * OW2):             # layer-2 output position (y2, x2)
            y2, x2 = divmod(s2, OW2)
            Y1, X1 = y2 * S + i2, x2 * S + j2   # required layer-1 output position
            for n in range(N):
                counts[n, Y1, X1] += 1
                row_pos[r] = (n, Y1, X1)
                c = 0
                for t1 in range(K * K):         # layer-1 tap (i1, j1)
                    i1, j1 = divmod(t1, K)
                    iy, ix = Y1 * S + i1, X1 * S + j1
                    for cin in range(C):
                        idx[r, c] = ((n * H + iy) * W + ix) * C + cin
                        c += 1
                r += 1
    # Exact BN1 batch statistics from the duplicated rows require every layer-1
    # output position to be referenced by layer 2 (true for the 16->7->3->1 geometry).
    assert (counts > 0).all(), "fused BN1 needs full layer-1 output coverage"
    n_unique = N * OH1 * OW1
    wrow = np.zeros((1, R), np.float32)
    for rr in range(R):
        n, Y1, X1 = row_pos[rr]
        wrow[0, rr] = 1.0 / (n_unique * counts[n, Y1, X1])
    return jnp.asarray(idx), jnp.asarray(wrow)


# ------------------------------- Pallas kernel ------------------------------ #

def _bn_relu(y, gamma, beta, wrow=None):
    """Training-mode BatchNorm2d (batch stats, biased var) + ReLU, all in f32.

    If `wrow` (1, M) is given, statistics are computed on the MXU as wrow @ y and
    wrow @ y^2 (weights already include the 1/M_unique factor); otherwise a plain
    VPU mean over rows is used (only for the tiny M=N layer-3 case)."""
    if wrow is None:
        mu = jnp.mean(y, axis=0, keepdims=True)
        ms = jnp.mean(y * y, axis=0, keepdims=True)
    else:
        mu = jnp.dot(wrow, y, preferred_element_type=jnp.float32)
        ms = jnp.dot(wrow, y * y, preferred_element_type=jnp.float32)
    var = jnp.maximum(ms - mu * mu, 0.0)          # clamp f32 cancellation (no NaN)
    scale = gamma * lax.rsqrt(var + BN_EPS)
    shift = beta - mu * scale
    return jnp.maximum(y * scale + shift, 0.0)


def cnn_fused_kernel(kk,
                     p1_ref, w1_ref, bn1w_ref, g1_ref, be1_ref,
                     w2_ref, g2_ref, be2_ref,
                     w3_ref, g3_ref, be3_ref,
                     wfc_ref, bfc_ref, out_ref):
    f32, bf16 = jnp.float32, jnp.bfloat16
    n_batch = out_ref.shape[0]

    # ---- layer 1: one GEMM over the duplicated patch rows + weighted BN + ReLU ----
    y1 = jnp.dot(p1_ref[...], w1_ref[...], preferred_element_type=f32)   # (162, 32)
    a1 = _bn_relu(y1, g1_ref[...], be1_ref[...], wrow=bn1w_ref[...])     # f32

    # ---- layer 2: tap blocks are contiguous row slabs; lane-concat -> one deep-K GEMM
    m2 = a1.shape[0] // kk                                               # 18
    p2 = jnp.concatenate([a1[t * m2:(t + 1) * m2, :] for t in range(kk)], axis=1)
    y2 = jnp.dot(p2.astype(bf16), w2_ref[...], preferred_element_type=f32)  # (18, 64)
    w2row = jnp.full((1, m2), 1.0 / m2, f32)
    a2 = _bn_relu(y2, g2_ref[...], be2_ref[...], wrow=w2row)             # f32

    # ---- layer 3: rows are (spatial-major, image-minor) so per-tap slabs are
    # contiguous; lane-concat -> (N, K*K*C2) and ONE GEMM (replaces 18 tiny matmuls)
    p3 = jnp.concatenate(
        [a2[p * n_batch:(p + 1) * n_batch, :] for p in range(kk)], axis=1)
    y3 = jnp.dot(p3.astype(bf16), w3_ref[...], preferred_element_type=f32)  # (N, 128)
    a3 = _bn_relu(y3, g3_ref[...], be3_ref[...])                          # f32

    # ---- flatten (oh3*ow3 == 1) + fc + relu + log_softmax(dim=1) -------------------
    z = jnp.dot(a3.astype(bf16), wfc_ref[...], preferred_element_type=f32) + bfc_ref[...]
    z = jnp.maximum(z, 0.0)
    mx = jnp.max(z, axis=-1, keepdims=True)
    lse = jnp.log(jnp.sum(jnp.exp(z - mx), axis=-1, keepdims=True)) + mx
    out_ref[...] = z - lse


def _vmem():
    return pl.BlockSpec(memory_space=pltpu.MemorySpace.VMEM)


def cnn_fused(p1, w1, bn1w, g1, be1, w2, g2, be2, w3, g3, be3, wfc, bfc,
              n_batch, kk):
    args = (p1, w1, bn1w, g1, be1, w2, g2, be2, w3, g3, be3, wfc, bfc)
    m2 = p1.shape[0] // kk
    flops = 2 * (p1.shape[0] * p1.shape[1] * w1.shape[1]     # conv1 GEMM
                 + 2 * p1.shape[0] * w1.shape[1]             # BN1 stat dots
                 + m2 * w2.shape[0] * w2.shape[1]            # conv2 GEMM
                 + 2 * m2 * w2.shape[1]                      # BN2 stat dots
                 + n_batch * w3.shape[0] * w3.shape[1]       # conv3 GEMM
                 + n_batch * wfc.shape[0] * wfc.shape[1])    # fc GEMM
    transcendentals = (n_batch * (wfc.shape[1] + 1)          # exp + log
                       + w1.shape[1] + w2.shape[1] + w3.shape[1])  # rsqrt per channel
    bytes_accessed = (sum(int(np.prod(a.shape)) * a.dtype.itemsize for a in args)
                      + n_batch * wfc.shape[1] * 4)
    return pl.pallas_call(
        functools.partial(cnn_fused_kernel, kk),
        out_shape=jax.ShapeDtypeStruct((n_batch, wfc.shape[1]), jnp.float32),
        in_specs=[_vmem() for _ in range(len(args))],
        out_specs=_vmem(),
        cost_estimate=pl.CostEstimate(flops=flops,
                                      transcendentals=transcendentals,
                                      bytes_accessed=bytes_accessed),
    )(*args)


# --------------------------------- JAX glue --------------------------------- #

def init_params(key, C, W, H, K, S, N):
    """Synthetic parameters matching the module's shapes.
    Conv weights are stored as (K*K*Cin, Cout) with (kh, kw, cin) row order (a row
    permutation of PyTorch's (Cout, Cin, K, K)).  Conv biases are omitted: they are
    exactly cancelled by training-mode BatchNorm."""
    OH1 = conv2d_size_out(H, K, S)
    OH2 = conv2d_size_out(OH1, K, S)
    OH3 = conv2d_size_out(OH2, K, S)
    linear_input_size = OH3 * OH3 * 128
    # The fused layer-3 single-GEMM path assumes the last conv consumes the whole
    # layer-2 output (tap index == spatial index).  Holds for 16 -> 7 -> 3 -> 1.
    # TODO(synk): generalize layer-3 regrouping for OH2 != K or OH3 > 1.
    assert OH2 == K and OH3 == 1, (OH2, OH3)

    keys = jax.random.split(key, 5)
    scale = 0.1

    def conv_w(k, cin, cout):
        return (scale * jax.random.normal(k, (K * K * cin, cout),
                                          jnp.float32)).astype(jnp.bfloat16)

    gather_idx, bn1_wrow = build_fused_gather(N, H, W, C, K, S)

    params = {
        "w1": conv_w(keys[0], C, 32),
        "w2": conv_w(keys[1], 32, 64),
        "w3": conv_w(keys[2], 64, 128),
        # BatchNorm affine params (PyTorch default init: weight=1, bias=0)
        "g1": jnp.ones((1, 32), jnp.float32),  "be1": jnp.zeros((1, 32), jnp.float32),
        "g2": jnp.ones((1, 64), jnp.float32),  "be2": jnp.zeros((1, 64), jnp.float32),
        "g3": jnp.ones((1, 128), jnp.float32), "be3": jnp.zeros((1, 128), jnp.float32),
        # fc weight rows in channel order (oh3*ow3 == 1 so it equals the NCHW flatten)
        "wfc": (scale * jax.random.normal(keys[3], (linear_input_size, 10),
                                          jnp.float32)).astype(jnp.bfloat16),
        "bfc": scale * jax.random.normal(keys[4], (1, 10), jnp.float32),
        # host-built gather plan + weighted BN1 row vector
        "gather_idx": gather_idx,
        "bn1_wrow": bn1_wrow,
    }
    return params, linear_input_size


@functools.partial(jax.jit, static_argnames=("K",))
def cnn_forward(params, x_nchw, K):
    # NCHW -> NHWC, bf16, then gather the duplicated tap-major layer-1 patches (XLA glue).
    x = jnp.transpose(x_nchw, (0, 2, 3, 1)).astype(jnp.bfloat16)
    p1 = x.reshape(-1)[params["gather_idx"]]            # (K*K*OH2*OW2*N, K*K*C) bf16
    n_batch = x_nchw.shape[0]
    return cnn_fused(p1,
                     params["w1"], params["bn1_wrow"], params["g1"], params["be1"],
                     params["w2"], params["g2"], params["be2"],
                     params["w3"], params["g3"], params["be3"],
                     params["wfc"], params["bfc"], n_batch, K * K)


# ------------------------- pure-JAX reference (check) ------------------------ #

def reference_forward(params, x_nchw, K, S):
    """Mirror of the PyTorch CNN forward (train-mode BN, biased var), with activations
    cast to bf16 at the same points as the Pallas kernel (expect ~1e-2 level agreement)."""
    f32, bf16 = jnp.float32, jnp.bfloat16
    dn = ("NHWC", "HWIO", "NHWC")

    def conv(x, w_rows, cin, cout):
        w = w_rows.astype(f32).reshape(K, K, cin, cout)   # rows were (kh, kw, cin)
        return lax.conv_general_dilated(x.astype(bf16), w.astype(bf16), (S, S), "VALID",
                                        dimension_numbers=dn,
                                        preferred_element_type=f32)

    def bn_relu(y, g, b):
        mu = jnp.mean(y, axis=(0, 1, 2), keepdims=True)
        var = jnp.mean((y - mu) ** 2, axis=(0, 1, 2), keepdims=True)
        yn = (y - mu) * lax.rsqrt(var + BN_EPS)
        return jnp.maximum(yn * g.reshape(1, 1, 1, -1) + b.reshape(1, 1, 1, -1), 0.0)

    x = jnp.transpose(x_nchw, (0, 2, 3, 1)).astype(f32)
    a1 = bn_relu(conv(x, params["w1"], x.shape[-1], 32), params["g1"], params["be1"])
    a2 = bn_relu(conv(a1, params["w2"], 32, 64), params["g2"], params["be2"])
    a3 = bn_relu(conv(a2, params["w3"], 64, 128), params["g3"], params["be3"])
    a3 = a3.reshape(a3.shape[0], -1)
    z = jnp.dot(a3.astype(bf16), params["wfc"], preferred_element_type=f32) + params["bfc"]
    z = jnp.maximum(z, 0.0)
    return jax.nn.log_softmax(z, axis=-1)


if __name__ == "__main__":
    # Small shapes consistent with the module: C=4, W=H=16, K=3, S=2, batch=2.
    C, W, H, K, S = 4, 16, 16, 3, 2
    N = 2

    key = jax.random.PRNGKey(0)
    kx, kp = jax.random.split(key)
    x = jax.random.normal(kx, (N, C, H, W), jnp.float32)   # NCHW input

    params, linear_input_size = init_params(kp, C, W, H, K, S, N)
    assert linear_input_size == 128

    out = cnn_forward(params, x, K)
    jax.block_until_ready(out)

    assert out.shape == (N, 10), out.shape
    # log_softmax rows should sum to 1 after exp
    assert jnp.allclose(jnp.exp(out).sum(axis=-1), 1.0, atol=1e-3)
    # cross-check against a pure-JAX conv reference (bf16 activations -> loose atol)
    ref = reference_forward(params, x, K, S)
    assert jnp.allclose(out, ref.astype(out.dtype), atol=0.15), (
        float(jnp.max(jnp.abs(out - ref))))
    print("KERNEL_OK")
</pallas_src>

<mosaic_0001>
module attributes {stable_mosaic.version = 11 : i64} {
  func.func @cnn_fused_kernel(%arg0: memref<162x36xbf16, #tpu.memory_space<vmem>>, %arg1: memref<36x32xbf16, #tpu.memory_space<vmem>>, %arg2: memref<1x162xf32, #tpu.memory_space<vmem>>, %arg3: memref<1x32xf32, #tpu.memory_space<vmem>>, %arg4: memref<1x32xf32, #tpu.memory_space<vmem>>, %arg5: memref<288x64xbf16, #tpu.memory_space<vmem>>, %arg6: memref<1x64xf32, #tpu.memory_space<vmem>>, %arg7: memref<1x64xf32, #tpu.memory_space<vmem>>, %arg8: memref<576x128xbf16, #tpu.memory_space<vmem>>, %arg9: memref<1x128xf32, #tpu.memory_space<vmem>>, %arg10: memref<1x128xf32, #tpu.memory_space<vmem>>, %arg11: memref<128x10xbf16, #tpu.memory_space<vmem>>, %arg12: memref<1x10xf32, #tpu.memory_space<vmem>>, %arg13: memref<2x10xf32, #tpu.memory_space<vmem>>) attributes {dimension_semantics = [], scalar_prefetch = 0 : i64, scratch_operands = 0 : i64, tpu.core_type = #tpu.core_type<tc>} {
    %c0 = arith.constant 0 : index
    %c0_0 = arith.constant 0 : index
    %0 = vector.load %arg0[%c0, %c0_0] : memref<162x36xbf16, #tpu.memory_space<vmem>>, vector<162x36xbf16>
    %c0_1 = arith.constant 0 : index
    %c0_2 = arith.constant 0 : index
    %1 = vector.load %arg1[%c0_1, %c0_2] : memref<36x32xbf16, #tpu.memory_space<vmem>>, vector<36x32xbf16>
    %cst = arith.constant dense<0.000000e+00> : vector<162x32xf32>
    %2 = tpu.matmul %0, %1, %cst {dimension_numbers = #tpu.dot_dimension_numbers<[1], [0], [0], [1], [0, 0, 1, 1], [], []>} : vector<162x36xbf16>, vector<36x32xbf16>, vector<162x32xf32> -> vector<162x32xf32>
    %c0_3 = arith.constant 0 : index
    %c0_4 = arith.constant 0 : index
    %3 = vector.load %arg3[%c0_3, %c0_4] : memref<1x32xf32, #tpu.memory_space<vmem>>, vector<1x32xf32>
    %c0_5 = arith.constant 0 : index
    %c0_6 = arith.constant 0 : index
    %4 = vector.load %arg4[%c0_5, %c0_6] : memref<1x32xf32, #tpu.memory_space<vmem>>, vector<1x32xf32>
    %c0_7 = arith.constant 0 : index
    %c0_8 = arith.constant 0 : index
    %5 = vector.load %arg2[%c0_7, %c0_8] : memref<1x162xf32, #tpu.memory_space<vmem>>, vector<1x162xf32>
    %cst_9 = arith.constant dense<0.000000e+00> : vector<1x32xf32>
    %6 = tpu.matmul %5, %2, %cst_9 {dimension_numbers = #tpu.dot_dimension_numbers<[1], [0], [0], [1], [0, 0, 1, 1], [], []>} : vector<1x162xf32>, vector<162x32xf32>, vector<1x32xf32> -> vector<1x32xf32>
    %7 = arith.mulf %2, %2 : vector<162x32xf32>
    %cst_10 = arith.constant dense<0.000000e+00> : vector<1x32xf32>
    %8 = tpu.matmul %5, %7, %cst_10 {dimension_numbers = #tpu.dot_dimension_numbers<[1], [0], [0], [1], [0, 0, 1, 1], [], []>} : vector<1x162xf32>, vector<162x32xf32>, vector<1x32xf32> -> vector<1x32xf32>
    %9 = arith.mulf %6, %6 : vector<1x32xf32>
    %10 = arith.subf %8, %9 : vector<1x32xf32>
    %cst_11 = arith.constant 0.000000e+00 : f32
    %11 = vector.broadcast %cst_11 : f32 to vector<1x32xf32>
    %12 = arith.maximumf %10, %11 : vector<1x32xf32>
    %cst_12 = arith.constant 9.99999974E-6 : f32
    %13 = vector.broadcast %cst_12 : f32 to vector<1x32xf32>
    %14 = arith.addf %12, %13 : vector<1x32xf32>
    %15 = math.rsqrt %14 : vector<1x32xf32>
    %16 = arith.mulf %3, %15 : vector<1x32xf32>
    %17 = arith.mulf %6, %16 : vector<1x32xf32>
    %18 = arith.subf %4, %17 : vector<1x32xf32>
    %19 = vector.broadcast %16 : vector<1x32xf32> to vector<162x32xf32>
    %20 = arith.mulf %2, %19 : vector<162x32xf32>
    %21 = vector.broadcast %18 : vector<1x32xf32> to vector<162x32xf32>
    %22 = arith.addf %20, %21 : vector<162x32xf32>
    %cst_13 = arith.constant 0.000000e+00 : f32
    %23 = vector.broadcast %cst_13 : f32 to vector<162x32xf32>
    %24 = arith.maximumf %22, %23 : vector<162x32xf32>
    %25 = vector.extract_strided_slice %24 {offsets = [0, 0], sizes = [18, 32], strides = [1, 1]} : vector<162x32xf32> to vector<18x32xf32>
    %26 = vector.extract_strided_slice %24 {offsets = [18, 0], sizes = [18, 32], strides = [1, 1]} : vector<162x32xf32> to vector<18x32xf32>
    %27 = vector.extract_strided_slice %24 {offsets = [36, 0], sizes = [18, 32], strides = [1, 1]} : vector<162x32xf32> to vector<18x32xf32>
    %28 = vector.extract_strided_slice %24 {offsets = [54, 0], sizes = [18, 32], strides = [1, 1]} : vector<162x32xf32> to vector<18x32xf32>
    %29 = vector.extract_strided_slice %24 {offsets = [72, 0], sizes = [18, 32], strides = [1, 1]} : vector<162x32xf32> to vector<18x32xf32>
    %30 = vector.extract_strided_slice %24 {offsets = [90, 0], sizes = [18, 32], strides = [1, 1]} : vector<162x32xf32> to vector<18x32xf32>
    %31 = vector.extract_strided_slice %24 {offsets = [108, 0], sizes = [18, 32], strides = [1, 1]} : vector<162x32xf32> to vector<18x32xf32>
    %32 = vector.extract_strided_slice %24 {offsets = [126, 0], sizes = [18, 32], strides = [1, 1]} : vector<162x32xf32> to vector<18x32xf32>
    %33 = vector.extract_strided_slice %24 {offsets = [144, 0], sizes = [18, 32], strides = [1, 1]} : vector<162x32xf32> to vector<18x32xf32>
    %34 = tpu.concatenate %25, %26, %27, %28, %29, %30, %31, %32, %33 in 1 : vector<18x32xf32>, vector<18x32xf32>, vector<18x32xf32>, vector<18x32xf32>, vector<18x32xf32>, vector<18x32xf32>, vector<18x32xf32>, vector<18x32xf32>, vector<18x32xf32> -> vector<18x288xf32>
    %35 = arith.truncf %34 : vector<18x288xf32> to vector<18x288xbf16>
    %c0_14 = arith.constant 0 : index
    %c0_15 = arith.constant 0 : index
    %36 = vector.load %arg5[%c0_14, %c0_15] : memref<288x64xbf16, #tpu.memory_space<vmem>>, vector<288x64xbf16>
    %cst_16 = arith.constant dense<0.000000e+00> : vector<18x64xf32>
    %37 = tpu.matmul %35, %36, %cst_16 {dimension_numbers = #tpu.dot_dimension_numbers<[1], [0], [0], [1], [0, 0, 1, 1], [], []>} : vector<18x288xbf16>, vector<288x64xbf16>, vector<18x64xf32> -> vector<18x64xf32>
    %cst_17 = arith.constant 0.055555556 : f32
    %38 = vector.broadcast %cst_17 : f32 to vector<1x18xf32>
    %c0_18 = arith.constant 0 : index
    %c0_19 = arith.constant 0 : index
    %39 = vector.load %arg6[%c0_18, %c0_19] : memref<1x64xf32, #tpu.memory_space<vmem>>, vector<1x64xf32>
    %c0_20 = arith.constant 0 : index
    %c0_21 = arith.constant 0 : index
    %40 = vector.load %arg7[%c0_20, %c0_21] : memref<1x64xf32, #tpu.memory_space<vmem>>, vector<1x64xf32>
    %cst_22 = arith.constant dense<0.000000e+00> : vector<1x64xf32>
    %41 = tpu.matmul %38, %37, %cst_22 {dimension_numbers = #tpu.dot_dimension_numbers<[1], [0], [0], [1], [0, 0, 1, 1], [], []>} : vector<1x18xf32>, vector<18x64xf32>, vector<1x64xf32> -> vector<1x64xf32>
    %42 = arith.mulf %37, %37 : vector<18x64xf32>
    %cst_23 = arith.constant dense<0.000000e+00> : vector<1x64xf32>
    %43 = tpu.matmul %38, %42, %cst_23 {dimension_numbers = #tpu.dot_dimension_numbers<[1], [0], [0], [1], [0, 0, 1, 1], [], []>} : vector<1x18xf32>, vector<18x64xf32>, vector<1x64xf32> -> vector<1x64xf32>
    %44 = arith.mulf %41, %41 : vector<1x64xf32>
    %45 = arith.subf %43, %44 : vector<1x64xf32>
    %cst_24 = arith.constant 0.000000e+00 : f32
    %46 = vector.broadcast %cst_24 : f32 to vector<1x64xf32>
    %47 = arith.maximumf %45, %46 : vector<1x64xf32>
    %cst_25 = arith.constant 9.99999974E-6 : f32
    %48 = vector.broadcast %cst_25 : f32 to vector<1x64xf32>
    %49 = arith.addf %47, %48 : vector<1x64xf32>
    %50 = math.rsqrt %49 : vector<1x64xf32>
    %51 = arith.mulf %39, %50 : vector<1x64xf32>
    %52 = arith.mulf %41, %51 : vector<1x64xf32>
    %53 = arith.subf %40, %52 : vector<1x64xf32>
    %54 = vector.broadcast %51 : vector<1x64xf32> to vector<18x64xf32>
    %55 = arith.mulf %37, %54 : vector<18x64xf32>
    %56 = vector.broadcast %53 : vector<1x64xf32> to vector<18x64xf32>
    %57 = arith.addf %55, %56 : vector<18x64xf32>
    %cst_26 = arith.constant 0.000000e+00 : f32
    %58 = vector.broadcast %cst_26 : f32 to vector<18x64xf32>
    %59 = arith.maximumf %57, %58 : vector<18x64xf32>
    %60 = vector.extract_strided_slice %59 {offsets = [0, 0], sizes = [2, 64], strides = [1, 1]} : vector<18x64xf32> to vector<2x64xf32>
    %61 = vector.extract_strided_slice %59 {offsets = [2, 0], sizes = [2, 64], strides = [1, 1]} : vector<18x64xf32> to vector<2x64xf32>
    %62 = vector.extract_strided_slice %59 {offsets = [4, 0], sizes = [2, 64], strides = [1, 1]} : vector<18x64xf32> to vector<2x64xf32>
    %63 = vector.extract_strided_slice %59 {offsets = [6, 0], sizes = [2, 64], strides = [1, 1]} : vector<18x64xf32> to vector<2x64xf32>
    %64 = vector.extract_strided_slice %59 {offsets = [8, 0], sizes = [2, 64], strides = [1, 1]} : vector<18x64xf32> to vector<2x64xf32>
    %65 = vector.extract_strided_slice %59 {offsets = [10, 0], sizes = [2, 64], strides = [1, 1]} : vector<18x64xf32> to vector<2x64xf32>
    %66 = vector.extract_strided_slice %59 {offsets = [12, 0], sizes = [2, 64], strides = [1, 1]} : vector<18x64xf32> to vector<2x64xf32>
    %67 = vector.extract_strided_slice %59 {offsets = [14, 0], sizes = [2, 64], strides = [1, 1]} : vector<18x64xf32> to vector<2x64xf32>
    %68 = vector.extract_strided_slice %59 {offsets = [16, 0], sizes = [2, 64], strides = [1, 1]} : vector<18x64xf32> to vector<2x64xf32>
    %69 = tpu.concatenate %60, %61, %62, %63, %64, %65, %66, %67, %68 in 1 : vector<2x64xf32>, vector<2x64xf32>, vector<2x64xf32>, vector<2x64xf32>, vector<2x64xf32>, vector<2x64xf32>, vector<2x64xf32>, vector<2x64xf32>, vector<2x64xf32> -> vector<2x576xf32>
    %70 = arith.truncf %69 : vector<2x576xf32> to vector<2x576xbf16>
    %c0_27 = arith.constant 0 : index
    %c0_28 = arith.constant 0 : index
    %71 = vector.load %arg8[%c0_27, %c0_28] : memref<576x128xbf16, #tpu.memory_space<vmem>>, vector<576x128xbf16>
    %cst_29 = arith.constant dense<0.000000e+00> : vector<2x128xf32>
    %72 = tpu.matmul %70, %71, %cst_29 {dimension_numbers = #tpu.dot_dimension_numbers<[1], [0], [0], [1], [0, 0, 1, 1], [], []>} : vector<2x576xbf16>, vector<576x128xbf16>, vector<2x128xf32> -> vector<2x128xf32>
    %c0_30 = arith.constant 0 : index
    %c0_31 = arith.constant 0 : index
    %73 = vector.load %arg9[%c0_30, %c0_31] : memref<1x128xf32, #tpu.memory_space<vmem>>, vector<1x128xf32>
    %c0_32 = arith.constant 0 : index
    %c0_33 = arith.constant 0 : index
    %74 = vector.load %arg10[%c0_32, %c0_33] : memref<1x128xf32, #tpu.memory_space<vmem>>, vector<1x128xf32>
    %cst_34 = arith.constant dense<0.000000e+00> : vector<128xf32>
    %75 = vector.multi_reduction <add>, %72, %cst_34 [0] : vector<2x128xf32> to vector<128xf32>
    %76 = vector.shape_cast %75 : vector<128xf32> to vector<1x128xf32>
    %cst_35 = arith.constant 2.000000e+00 : f32
    %77 = vector.broadcast %cst_35 : f32 to vector<1x128xf32>
    %78 = arith.divf %76, %77 : vector<1x128xf32>
    %79 = arith.mulf %72, %72 : vector<2x128xf32>
    %cst_36 = arith.constant dense<0.000000e+00> : vector<128xf32>
    %80 = vector.multi_reduction <add>, %79, %cst_36 [0] : vector<2x128xf32> to vector<128xf32>
    %81 = vector.shape_cast %80 : vector<128xf32> to vector<1x128xf32>
    %cst_37 = arith.constant 2.000000e+00 : f32
    %82 = vector.broadcast %cst_37 : f32 to vector<1x128xf32>
    %83 = arith.divf %81, %82 : vector<1x128xf32>
    %84 = arith.mulf %78, %78 : vector<1x128xf32>
    %85 = arith.subf %83, %84 : vector<1x128xf32>
    %cst_38 = arith.constant 0.000000e+00 : f32
    %86 = vector.broadcast %cst_38 : f32 to vector<1x128xf32>
    %87 = arith.maximumf %85, %86 : vector<1x128xf32>
    %cst_39 = arith.constant 9.99999974E-6 : f32
    %88 = vector.broadcast %cst_39 : f32 to vector<1x128xf32>
    %89 = arith.addf %87, %88 : vector<1x128xf32>
    %90 = math.rsqrt %89 : vector<1x128xf32>
    %91 = arith.mulf %73, %90 : vector<1x128xf32>
    %92 = arith.mulf %78, %91 : vector<1x128xf32>
    %93 = arith.subf %74, %92 : vector<1x128xf32>
    %94 = vector.broadcast %91 : vector<1x128xf32> to vector<2x128xf32>
    %95 = arith.mulf %72, %94 : vector<2x128xf32>
    %96 = vector.broadcast %93 : vector<1x128xf32> to vector<2x128xf32>
    %97 = arith.addf %95, %96 : vector<2x128xf32>
    %cst_40 = arith.constant 0.000000e+00 : f32
    %98 = vector.broadcast %cst_40 : f32 to vector<2x128xf32>
    %99 = arith.maximumf %97, %98 : vector<2x128xf32>
    %100 = arith.truncf %99 : vector<2x128xf32> to vector<2x128xbf16>
    %c0_41 = arith.constant 0 : index
    %c0_42 = arith.constant 0 : index
    %101 = vector.load %arg11[%c0_41, %c0_42] : memref<128x10xbf16, #tpu.memory_space<vmem>>, vector<128x10xbf16>
    %cst_43 = arith.constant dense<0.000000e+00> : vector<2x10xf32>
    %102 = tpu.matmul %100, %101, %cst_43 {dimension_numbers = #tpu.dot_dimension_numbers<[1], [0], [0], [1], [0, 0, 1, 1], [], []>} : vector<2x128xbf16>, vector<128x10xbf16>, vector<2x10xf32> -> vector<2x10xf32>
    %c0_44 = arith.constant 0 : index
    %c0_45 = arith.constant 0 : index
    %103 = vector.load %arg12[%c0_44, %c0_45] : memref<1x10xf32, #tpu.memory_space<vmem>>, vector<1x10xf32>
    %104 = vector.broadcast %103 : vector<1x10xf32> to vector<2x10xf32>
    %105 = arith.addf %102, %104 : vector<2x10xf32>
    %cst_46 = arith.constant 0.000000e+00 : f32
    %106 = vector.broadcast %cst_46 : f32 to vector<2x10xf32>
    %107 = arith.maximumf %105, %106 : vector<2x10xf32>
    %cst_47 = arith.constant dense<0xFF800000> : vector<2xf32>
    %108 = vector.multi_reduction <maximumf>, %107, %cst_47 [1] : vector<2x10xf32> to vector<2xf32>
    %109 = vector.shape_cast %108 : vector<2xf32> to vector<2x1xf32>
    %110 = vector.broadcast %109 : vector<2x1xf32> to vector<2x10xf32>
    %111 = arith.subf %107, %110 : vector<2x10xf32>
    %112 = math.exp %111 : vector<2x10xf32>
    %cst_48 = arith.constant dense<0.000000e+00> : vector<2xf32>
    %113 = vector.multi_reduction <add>, %112, %cst_48 [1] : vector<2x10xf32> to vector<2xf32>
    %114 = vector.shape_cast %113 : vector<2xf32> to vector<2x1xf32>
    %115 = math.log %114 : vector<2x1xf32>
    %116 = arith.addf %115, %109 : vector<2x1xf32>
    %117 = vector.broadcast %116 : vector<2x1xf32> to vector<2x10xf32>
    %118 = arith.subf %107, %117 : vector<2x10xf32>
    %c0_49 = arith.constant 0 : index
    %c0_50 = arith.constant 0 : index
    %119 = vector.load %arg13[%c0_49, %c0_50] : memref<2x10xf32, #tpu.memory_space<vmem>>, vector<2x10xf32>
    tpu.vector_store %arg13[%c0_49, %c0_50], %118 {strides = array<i32>} : memref<2x10xf32, #tpu.memory_space<vmem>>, vector<2x10xf32>,
    return
  }
}

</mosaic_0001>

<bundles_post_ra>
// kernel: cnn_forward.1
= control target key start
LH: loop header
LB: loop body
LE: loop exit
PB: predicated region body
PF: predicated region fallthrough
CT: control target
= control target key end

     0   :  { %v2306_v1 = vmov 0.0   ;;  %vm2307_vm0 = vmmov 0   ;;  %vm174_vm1 = vcmask 1041408   ;;  %vm140_vm2 = vcmask 293888   ;;  %s3085_s0 = inlined_call_operand.vmem [shape: bf16[162,36], index: 0, kind: input, shape index: {}]   ;;  %s3086_s1 = inlined_call_operand.vmem [shape: bf16[36,32], index: 1, kind: input, shape index: {}]   ;;  %s3087_s2 = inlined_call_operand.vmem [shape: f32[1,162], index: 2, kind: input, shape index: {}]   ;;  %s3088_s3 = inlined_call_operand.vmem [shape: f32[1,32], index: 3, kind: input, shape index: {}]   ;;  %s3089_s4 = inlined_call_operand.vmem [shape: f32[1,32], index: 4, kind: input, shape index: {}]   ;;  %s3090_s5 = inlined_call_operand.vmem [shape: bf16[288,64], index: 5, kind: input, shape index: {}]   ;;  %s3091_s6 = inlined_call_operand.vmem [shape: f32[1,64], index: 6, kind: input, shape index: {}]   ;;  %s3092_s7 = inlined_call_operand.vmem [shape: f32[1,64], index: 7, kind: input, shape index: {}]   ;;  %s3093_s8 = inlined_call_operand.vmem [shape: bf16[576,128], index: 8, kind: input, shape index: {}]   ;;  %s3094_s9 = inlined_call_operand.vmem [shape: f32[1,128], index: 9, kind: input, shape index: {}]   ;;  %s3095_s10 = inlined_call_operand.vmem [shape: f32[1,128], index: 10, kind: input, shape index: {}]   ;;  %s3096_s11 = inlined_call_operand.vmem [shape: bf16[128,10], index: 11, kind: input, shape index: {}]   ;;  %s3097_s12 = inlined_call_operand.vmem [shape: f32[1,10], index: 12, kind: input, shape index: {}]   ;;  %s3098_s13 = inlined_call_operand.hbm [shape: f32[2,10], index: 13, kind: output, shape index: {}]  }
   0x1   :  { %v2196_v0 = vld [vmem:[%s3086_s1] sm:$0xff]   ;;  %1959 = vmatprep.subr.bf16.mxu0 %v2306_v1  ;;  %v2197_v2 = vld [vmem:[%s3086_s1 + $0x8] sm:$0xff]   ;;  %v2198_v3 = vld [vmem:[%s3086_s1 + $0x10] ss:$0 sps:$4 sm:$0x33]   ;;  %1965 = vmatprep.mubr.msk.bf16.mxu0 %vm2307_vm0, %v2306_v1 }
   0x2   :  { %1960 = vmatpush3.bf16.msra.mxu0 %v2196_v0  ;;  %v176_v4 = vsel %vm174_vm1, %v2198_v3, 0  ;;  %v2199_v5 = vld [vmem:[%s3085_s0] sm:$0xff]   ;;  %v2200_v6 = vld [vmem:[%s3085_s0 + $0x8] sm:$0xff]   ;;  %v2201_v7 = vld [vmem:[%s3085_s0 + $0x10] sm:$0xff]  }
   0x3   :  { %1961 = vmatprep.subr.bf16.mxu0 %v2306_v1  ;;  %v2202_v8 = vld [vmem:[%s3085_s0 + $0x18] sm:$0xff]   ;;  %v2203_v9 = vld [vmem:[%s3085_s0 + $0x20] sm:$0xff]   ;;  %v2204_v10 = vld [vmem:[%s3085_s0 + $0x28] sm:$0xff]  }
   0x6   :  { %1962 = vmatpush3.bf16.msra.mxu0 %v2197_v2 }
   0x7   :  { %1963 = vmatprep.subr.bf16.mxu0 %v2306_v1 }
   0xa   :  { %1964 = vmatpush3.bf16.msra.mxu0 %v176_v4 }
   0xd   :  { %1966 = vmatmul.mubr.msk.bf16.vlgmr.msra.gmra.mrb[0].mxu0 %vm140_vm2, %v2199_v5 }
   0xe   :  { %1969 = vmatprep.mubr.msk.bf16.mxu0 %vm2307_vm0, %v2306_v1 }
  0x15   :  { %1970 = vmatmul.mubr.msk.bf16.gmra.mrb[4].mxu0 %vm140_vm2, %v2200_v6 }
  0x16   :  { %1973 = vmatprep.mubr.msk.bf16.mxu0 %vm2307_vm0, %v2306_v1 }
  0x1d   :  { %1974 = vmatmul.mubr.msk.bf16.gmra.mrb[8].mxu0 %vm140_vm2, %v2201_v7 }
  0x1e   :  { %1977 = vmatprep.mubr.msk.bf16.mxu0 %vm2307_vm0, %v2306_v1 }
  0x25   :  { %1978 = vmatmul.mubr.msk.bf16.gmra.mrb[12].mxu0 %vm140_vm2, %v2202_v8 }
  0x26   :  { %1981 = vmatprep.mubr.msk.bf16.mxu0 %vm2307_vm0, %v2306_v1 }
  0x2d   :  { %1982 = vmatmul.mubr.msk.bf16.gmra.mrb[16].mxu0 %vm140_vm2, %v2203_v9 }
  0x2e   :  { %1985 = vmatprep.mubr.msk.bf16.mxu0 %vm2307_vm0, %v2306_v1 }
  0x35   :  { %1986 = vmatmul.mubr.msk.bf16.gmra.mrb[20].mxu0 %vm140_vm2, %v2204_v10 }
  0x36   :  { %1989 = vmatprep.mubr.msk.bf16.mxu0 %vm2307_vm0, %v2306_v1 }
  0x37   :  { %18 = vsyncpa [#allocation3], 0  ;;  %v2205_v11 = vld [vmem:[%s3085_s0 + $0x30] sm:$0xff]   ;;  %v2206_v12 = vld [vmem:[%s3085_s0 + $0x38] sm:$0xff]   ;;  %v2308_v16 = vmov 0.0|0.0   ;;  %v302_v17 = vlaneseq  ;;  %vm311_vm3 = vcmask 277504  }
  0x38   :  { %v2207_v13 = vld [vmem:[%s3085_s0 + $0x40] sm:$0xff]   ;;  %v2208_v14 = vld [vmem:[%s3085_s0 + $0x48] sm:$0xff]   ;;  %v2209_v15 = vld [vmem:[%s3085_s0 + $0x50] ss:$0 sps:$4 sm:$0x11]   ;;  %2067 = vmatprep.subr.bf16.mxu1 %v2308_v16  ;;  %vm584_vm4 = vcmask 1043456  }
  0x39   :  { %v2464_v18 = vshrl.u32 %v302_v17, 7  ;;  %v2470_v20 = vld [vmem:[%s3087_s2] sm:$0x3]  ;;  %vm567_vm5 = vcmask 1045504   ;;  %s2309_s14 = smov 64   ;;  %s2310_s15 = smov 32  }
  0x3a   :  { %s2311_s17 = smov 96   ;;  %vm664_vm6 = vcmask 261120   ;;  %vm668_vm7 = vcmask 523264   ;;  %vm672_vm8 = vcmask 785408   ;;  %vm939_vm9 = vcmask 146432  }
  0x3b   :  { %v308_v19 = vsub.s32 1, %v2464_v18  ;;  %vm1719_vm10 = vcmask 74752  }
  0x3d   :  { %1990 = vmatmul.mubr.msk.bf16.gmra.mrb[24].mxu0 %vm140_vm2, %v2205_v11  ;;  %v2473_v21 = vrot.slane %v2470_v20, %v308_v19 }
  0x3e   :  { %1993 = vmatprep.mubr.msk.bf16.mxu0 %vm2307_vm0, %v2306_v1 }
  0x3f   :  { %1774 = vmatprep.mubr.msk.f32.mxu1 %vm311_vm3, %v2473_v21 }
  0x45   :  { %1994 = vmatmul.mubr.msk.bf16.gmra.mrb[28].mxu0 %vm140_vm2, %v2206_v12 }
  0x46   :  { %1997 = vmatprep.mubr.msk.bf16.mxu0 %vm2307_vm0, %v2306_v1 }
  0x4d   :  { %1998 = vmatmul.mubr.msk.bf16.gmra.mrb[32].mxu0 %vm140_vm2, %v2207_v13 }
  0x4e   :  { %2001 = vmatprep.mubr.msk.bf16.mxu0 %vm2307_vm0, %v2306_v1 }
  0x55   :  { %2002 = vmatmul.mubr.msk.bf16.gmra.mrb[36].mxu0 %vm140_vm2, %v2208_v14 }
  0x56   :  { %2005 = vmatprep.mubr.msk.bf16.mxu0 %vm2307_vm0, %v2306_v1 }
  0x5d   :  { %2006 = vmatmul.mubr.msk.bf16.gmra.mrb[40].mxu0 %vm140_vm2, %v2209_v15 }
  0xe0   :  { %v2477_v22 = vpop.f32.mrb[0].mxu0 }
  0xe1   :  { %v1967_v23 = vpop.f32.mrb[1].mxu0  ;;  %v2483_v25 = vmul.f32 %v2477_v22, %v2477_v22 }
  0xe2   :  { %v2479_v24 = vpop.f32.mrb[2].mxu0 }
  0xe3   :  { %v2487_v26 = vmul.f32 %v2479_v24, %v2479_v24  ;;  %v1968_v27 = vpop.f32.mrb[3].mxu0  ;;  %v2068_v28 = vpack.c.bf16 %v2479_v24, %v2477_v22 }
  0xe5   :  { %v2098_v29 = vpack.c.bf16 %v2487_v26, %v2483_v25  ;;  %2069 = vmatpush1.bf16.msra.mxu1 %v2068_v28  ;;  %v2211_v25 = vld [vmem:[%s3090_s5] sm:$0xff]   ;;  %v2212_v26 = vld [vmem:[%s3090_s5 + $0x48] sm:$0xff]  }
  0xe6   :  { %2070 = vmatprep.subr.bf16.mxu1 %v2308_v16 }
  0xe8   :  { %v2494_v30 = vpop.f32.mrb[4].mxu0 }
  0xe9   :  { %v1971_v31 = vpop.f32.mrb[5].mxu0  ;;  %v2500_v33 = vmul.f32 %v2494_v30, %v2494_v30 }
  0xea   :  { %v2496_v32 = vpop.f32.mrb[6].mxu0 }
  0xeb   :  { %v2071_v34 = vpack.c.bf16 %v2496_v32, %v2494_v30  ;;  %v2506_v35 = vmul.f32 %v2496_v32, %v2496_v32  ;;  %v1972_v36 = vpop.f32.mrb[7].mxu0 }
  0xed   :  { %v2101_v37 = vpack.c.bf16 %v2506_v35, %v2500_v33  ;;  %2072 = vmatpush1.bf16.msra.mxu1 %v2071_v34  ;;  %v2214_v33 = vld [vmem:[%s3090_s5 + $0x50] sm:$0xff]  }
  0xee   :  { %2073 = vmatprep.subr.bf16.mxu1 %v2308_v16  ;;  %v2215_v35 = vld [vmem:[%s3090_s5 + $0x10] sm:$0xff]  }
  0xf0   :  { %v2511_v38 = vpop.f32.mrb[8].mxu0 }
  0xf1   :  { %v1975_v39 = vpop.f32.mrb[9].mxu0  ;;  %v2517_v41 = vmul.f32 %v2511_v38, %v2511_v38 }
  0xf2   :  { %v2513_v40 = vpop.f32.mrb[10].mxu0 }
  0xf3   :  { %v2074_v42 = vpack.c.bf16 %v2513_v40, %v2511_v38  ;;  %v2523_v43 = vmul.f32 %v2513_v40, %v2513_v40  ;;  %v1976_v44 = vpop.f32.mrb[11].mxu0 }
  0xf5   :  { %v2104_v45 = vpack.c.bf16 %v2523_v43, %v2517_v41  ;;  %2075 = vmatpush1.bf16.msra.mxu1 %v2074_v42  ;;  %v2217_v41 = vld [vmem:[%s3090_s5 + $0x18] sm:$0xff]   ;;  %v2218_v43 = vld [vmem:[%s3090_s5 + $0x60] sm:$0xff]  }
  0xf6   :  { %2076 = vmatprep.subr.bf16.mxu1 %v2308_v16 }
  0xf8   :  { %v2528_v46 = vpop.f32.mrb[12].mxu0 }
  0xf9   :  { %v1979_v47 = vpop.f32.mrb[13].mxu0  ;;  %v2534_v49 = vmul.f32 %v2528_v46, %v2528_v46 }
  0xfa   :  { %v2530_v48 = vpop.f32.mrb[14].mxu0 }
  0xfb   :  { %v2077_v50 = vpack.c.bf16 %v2530_v48, %v2528_v46  ;;  %v2540_v51 = vmul.f32 %v2530_v48, %v2530_v48  ;;  %v1980_v52 = vpop.f32.mrb[15].mxu0 }
  0xfd   :  { %v2107_v53 = vpack.c.bf16 %v2540_v51, %v2534_v49  ;;  %2078 = vmatpush1.bf16.msra.mxu1 %v2077_v50  ;;  %v2220_v49 = vld [vmem:[%s3090_s5 + $0x68] sm:$0xff]  }
  0xfe   :  { %2079 = vmatprep.subr.bf16.mxu1 %v2308_v16  ;;  %v2221_v51 = vld [vmem:[%s3090_s5 + $0x28] sm:$0xff]  }
 0x100   :  { %v2545_v54 = vpop.f32.mrb[16].mxu0 }
 0x101   :  { %v1983_v55 = vpop.f32.mrb[17].mxu0  ;;  %v2551_v57 = vmul.f32 %v2545_v54, %v2545_v54 }
 0x102   :  { %v2547_v56 = vpop.f32.mrb[18].mxu0 }
 0x103   :  { %v2080_v58 = vpack.c.bf16 %v2547_v56, %v2545_v54  ;;  %v2557_v59 = vmul.f32 %v2547_v56, %v2547_v56  ;;  %v1984_v60 = vpop.f32.mrb[19].mxu0 }
 0x105   :  { %v2110_v61 = vpack.c.bf16 %v2557_v59, %v2551_v57  ;;  %2081 = vmatpush1.bf16.msra.mxu1 %v2080_v58  ;;  %v2223_v57 = vld [vmem:[%s3090_s5 + $0x30] sm:$0xff]  }
 0x106   :  { %2082 = vmatprep.subr.bf16.mxu1 %v2308_v16 }
 0x108   :  { %v2562_v62 = vpop.f32.mrb[20].mxu0 }
 0x109   :  { %v1987_v63 = vpop.f32.mrb[21].mxu0  ;;  %v2568_v2 = vmul.f32 %v2562_v62, %v2562_v62 }
 0x10a   :  { %v2564_v0 = vpop.f32.mrb[22].mxu0 }
 0x10b   :  { %v2083_v3 = vpack.c.bf16 %v2564_v0, %v2562_v62  ;;  %v2574_v4 = vmul.f32 %v2564_v0, %v2564_v0  ;;  %v1988_v5 = vpop.f32.mrb[23].mxu0 }
 0x10d   :  { %v2113_v6 = vpack.c.bf16 %v2574_v4, %v2568_v2  ;;  %2084 = vmatpush1.bf16.msra.mxu1 %v2083_v3  ;;  %v2617_v2 = vsub.s32 0, %v2464_v18 }
 0x10e   :  { %2085 = vmatprep.subr.bf16.mxu1 %v2308_v16 }
 0x110   :  { %v2579_v7 = vpop.f32.mrb[24].mxu0 }
 0x111   :  { %v1991_v8 = vpop.f32.mrb[25].mxu0  ;;  %v399_v10 = vmul.f32 %v2579_v7, %v2579_v7 }
 0x112   :  { %v2581_v9 = vpop.f32.mrb[26].mxu0 }
 0x113   :  { %v2086_v11 = vpack.c.bf16 %v2581_v9, %v2579_v7  ;;  %v400_v12 = vmul.f32 %v2581_v9, %v2581_v9  ;;  %v1992_v13 = vpop.f32.mrb[27].mxu0 }
 0x115   :  { %v2116_v14 = vpack.c.bf16 %v400_v12, %v399_v10  ;;  %2087 = vmatpush1.bf16.msra.mxu1 %v2086_v11  ;;  %v305_v11 = vrot.slane %v2470_v20, %v2617_v2 }
 0x116   :  { %2088 = vmatprep.subr.bf16.mxu1 %v2308_v16 }
 0x118   :  { %v2590_v15 = vpop.f32.mrb[28].mxu0 }
 0x119   :  { %v1995_v17 = vpop.f32.mrb[29].mxu0  ;;  %v401_v23 = vmul.f32 %v2590_v15, %v2590_v15 }
 0x11a   :  { %v2592_v19 = vpop.f32.mrb[30].mxu0 }
 0x11b   :  { %v2089_v27 = vpack.c.bf16 %v2592_v19, %v2590_v15  ;;  %v402_v28 = vmul.f32 %v2592_v19, %v2592_v19  ;;  %v1996_v31 = vpop.f32.mrb[31].mxu0 }
 0x11d   :  { %v2119_v34 = vpack.c.bf16 %v402_v28, %v401_v23  ;;  %2090 = vmatpush1.bf16.msra.mxu1 %v2089_v27 }
 0x11e   :  { %2091 = vmatprep.subr.bf16.mxu1 %v2308_v16 }
 0x120   :  { %v2601_v36 = vpop.f32.mrb[32].mxu0 }
 0x121   :  { %v1999_v39 = vpop.f32.mrb[33].mxu0  ;;  %v403_v44 = vmul.f32 %v2601_v36, %v2601_v36 }
 0x122   :  { %v2603_v42 = vpop.f32.mrb[34].mxu0 }
 0x123   :  { %v2092_v47 = vpack.c.bf16 %v2603_v42, %v2601_v36  ;;  %v404_v50 = vmul.f32 %v2603_v42, %v2603_v42  ;;  %v2000_v52 = vpop.f32.mrb[35].mxu0 }
 0x125   :  { %v2122_v55 = vpack.c.bf16 %v404_v50, %v403_v44  ;;  %2093 = vmatpush1.bf16.msra.mxu1 %v2092_v47  ;;  %v299_v47 = vld [vmem:[%s3089_s4] sm:$0x1] }
 0x126   :  { %2094 = vmatprep.subr.bf16.mxu1 %v2308_v16 }
 0x128   :  { %v2612_v58 = vpop.f32.mrb[36].mxu0 }
 0x129   :  { %v2003_v60 = vpop.f32.mrb[37].mxu0  ;;  %v405_v3 = vmul.f32 %v2612_v58, %v2612_v58 }
 0x12a   :  { %v2614_v63 = vpop.f32.mrb[38].mxu0 }
 0x12b   :  { %v2095_v4 = vpack.c.bf16 %v2614_v63, %v2612_v58  ;;  %v406_v5 = vmul.f32 %v2614_v63, %v2614_v63  ;;  %v2004_v8 = vpop.f32.mrb[39].mxu0 }
 0x12d   :  { %v2125_v10 = vpack.c.bf16 %v406_v5, %v405_v3  ;;  %2096 = vmatpush1.bf16.msra.mxu1 %v2095_v4 }
 0x12e   :  { %357 = vmatprep.subr.mxu1 %v2306_v1 }
 0x130   :  { %v2628_v12 = vpop.f32.mrb[40].mxu0 }
 0x131   :  { %v2007_v18 = vpop.f32.mrb[41].mxu0  ;;  %1773 = vmatpush1.msk.msra.mxu1 %vm174_vm1, %v2628_v12  ;;  %v407_v20 = vmul.f32 %v2628_v12, %v2628_v12 }
 0x132   :  { %v295_v13 = vpop.f32.mrb[42].mxu0  ;;  %382 = vmatmul.mubr.f32.vlgmr.msra.gmra.mrb[0].mxu1 %v305_v11  ;;  %2097 = vmatprep.subr.bf16.mxu1 %v2308_v16 }
 0x133   :  { %v2008_v17 = vpop.f32.mrb[43].mxu0  ;;  %2099 = vmatpush1.bf16.msra.mxu1 %v2098_v29  ;;  %1776 = vmatprep.mubr.msk.f32.mxu1 %vm311_vm3, %v2473_v21  ;;  %v2210_v21 = vld [vmem:[%s3090_s5 + $0x40] sm:$0xff]   ;;  %v2213_v29 = vld [vmem:[%s3090_s5 + $0x8] sm:$0xff]  }
 0x134   :  { %2100 = vmatprep.subr.bf16.mxu1 %v2308_v16  ;;  %1861 = vmatprep.subr.bf16.mxu0 %v2210_v21 }
 0x135   :  { %1862 = vmatpush3.bf16.msra.mxu0 %v2211_v25 }
 0x136   :  { %1863 = vmatprep.subr.bf16.mxu0 %v2212_v26 }
 0x137   :  { %2102 = vmatpush1.bf16.msra.mxu1 %v2101_v37  ;;  %v2216_v37 = vld [vmem:[%s3090_s5 + $0x58] sm:$0xff]  }
 0x138   :  { %2103 = vmatprep.subr.bf16.mxu1 %v2308_v16 }
 0x139   :  { %1864 = vmatpush3.bf16.msra.mxu0 %v2213_v29 }
 0x13a   :  { %1865 = vmatprep.subr.bf16.mxu0 %v2214_v33 }
 0x13b   :  { %2105 = vmatpush1.bf16.msra.mxu1 %v2104_v45  ;;  %v2219_v45 = vld [vmem:[%s3090_s5 + $0x20] sm:$0xff]  }
 0x13c   :  { %2106 = vmatprep.subr.bf16.mxu1 %v2308_v16 }
 0x13d   :  { %1866 = vmatpush3.bf16.msra.mxu0 %v2215_v35 }
 0x13e   :  { %1867 = vmatprep.subr.bf16.mxu0 %v2216_v37 }
 0x13f   :  { %2108 = vmatpush1.bf16.msra.mxu1 %v2107_v53  ;;  %v2222_v53 = vld [vmem:[%s3090_s5 + $0x70] sm:$0xff]  }
 0x140   :  { %2109 = vmatprep.subr.bf16.mxu1 %v2308_v16 }
 0x141   :  { %1868 = vmatpush3.bf16.msra.mxu0 %v2217_v41 }
 0x142   :  { %1869 = vmatprep.subr.bf16.mxu0 %v2218_v43 }
 0x143   :  { %2111 = vmatpush1.bf16.msra.mxu1 %v2110_v61 }
 0x144   :  { %2112 = vmatprep.subr.bf16.mxu1 %v2308_v16 }
 0x145   :  { %1870 = vmatpush3.bf16.msra.mxu0 %v2219_v45 }
 0x146   :  { %1871 = vmatprep.subr.bf16.mxu0 %v2220_v49 }
 0x147   :  { %2114 = vmatpush1.bf16.msra.mxu1 %v2113_v6 }
 0x148   :  { %2115 = vmatprep.subr.bf16.mxu1 %v2308_v16 }
 0x149   :  { %1872 = vmatpush3.bf16.msra.mxu0 %v2221_v51 }
 0x14a   :  { %1873 = vmatprep.subr.bf16.mxu0 %v2222_v53 }
 0x14b   :  { %2117 = vmatpush1.bf16.msra.mxu1 %v2116_v14 }
 0x14c   :  { %2118 = vmatprep.subr.bf16.mxu1 %v2308_v16 }
 0x14d   :  { %1874 = vmatpush3.bf16.msra.mxu0 %v2223_v57 }
 0x14f   :  { %2120 = vmatpush1.bf16.msra.mxu1 %v2119_v34  ;;  %v298_v34 = vld [vmem:[%s3088_s3] sm:$0x1] }
 0x150   :  { %2121 = vmatprep.subr.bf16.mxu1 %v2308_v16 }
 0x153   :  { %2123 = vmatpush1.bf16.msra.mxu1 %v2122_v55 }
 0x154   :  { %2124 = vmatprep.subr.bf16.mxu1 %v2308_v16 }
 0x157   :  { %2126 = vmatpush1.bf16.msra.mxu1 %v2125_v10 }
 0x158   :  { %451 = vmatprep.subr.mxu1 %v2306_v1 }
 0x15b   :  { %1775 = vmatpush1.msk.msra.mxu1 %vm174_vm1, %v407_v20 }
 0x15c   :  { %476 = vmatmul.mubr.f32.vlgmr.msra.gmra.mrb[2].mxu1 %v305_v11  ;;  %2127 = vmatprep.subr.bf16.mxu1 %v2308_v16 }
 0x15d   :  { %2023 = vmatprep.mubr.msk.f32.mxu1 %vm2307_vm0, %v2306_v1 }
 0x205   :  { %v383_v59 = vpop.f32.mrb[0].mxu1 }
 0x206   :  { %v385_v61 = vpop.f32.mrb[1].mxu1  ;;  %v481_v6 = vmul.f32 %v383_v59, %v383_v59 }
 0x22f   :  { %v477_v14 = vpop.f32.mrb[2].mxu1 }
 0x230   :  { %v482_v23 = vsub.f32 %v477_v14, %v481_v6  ;;  %v479_v27 = vpop.f32.mrb[3].mxu1 }
 0x231   :  { %v2225_v27 = vld [vmem:[%s3090_s5 + $0x38] sm:$0xff]  }
 0x232   :  { %v483_v28 = vmax.f32 %v482_v23, 0.0 }
 0x234   :  { %v484_v31 = vadd.f32 1e-05, %v483_v28 }
 0x236   :  { %2272 = vrsqrt.f32 %v484_v31 }
 0x240   :  { %v2273_v39 = vpop.eup %2272 }
 0x241   :  { %v486_v44 = vmul.f32 %v2273_v39, %v298_v34 }
 0x243   :  { %v487_v50 = vmul.f32 %v486_v44, %v383_v59  ;;  %v2715_v52 = vrot.slane %v486_v44, %v2617_v2 }
 0x245   :  { %v488_v55 = vsub.f32 %v299_v47, %v487_v50  ;;  %v508_v60 = vmul.f32 %v2715_v52, %v2581_v9  ;;  %v509_v3 = vmul.f32 %v2715_v52, %v2590_v15  ;;  %v510_v4 = vmul.f32 %v2715_v52, %v2592_v19 }
 0x246   :  { %v506_v5 = vmul.f32 %v2715_v52, %v2564_v0  ;;  %v507_v8 = vmul.f32 %v2715_v52, %v2579_v7  ;;  %v499_v10 = vmul.f32 %v2715_v52, %v2511_v38  ;;  %v500_v11 = vmul.f32 %v2715_v52, %v2513_v40 }
 0x247   :  { %v2732_v9 = vrot.slane %v488_v55, %v2617_v2  ;;  %v501_v15 = vmul.f32 %v2715_v52, %v2528_v46  ;;  %v497_v19 = vmul.f32 %v2715_v52, %v2494_v30  ;;  %v498_v0 = vmul.f32 %v2715_v52, %v2496_v32  ;;  %v2224_v46 = vld [vmem:[%s3090_s5 + $0x78] sm:$0xff]  }
 0x248   :  { %v502_v7 = vmul.f32 %v2715_v52, %v2530_v48  ;;  %v503_v38 = vmul.f32 %v2715_v52, %v2545_v54  ;;  %v511_v40 = vmul.f32 %v2715_v52, %v2601_v36  ;;  %v512_v18 = vmul.f32 %v2715_v52, %v2603_v42  ;;  %1875 = vmatprep.subr.bf16.mxu0 %v2224_v46 }
 0x249   :  { %v535_v30 = vadd.f32 %v2732_v9, %v508_v60  ;;  %v536_v32 = vadd.f32 %v2732_v9, %v509_v3  ;;  %v537_v13 = vadd.f32 %v2732_v9, %v510_v4  ;;  %v2755_v48 = vadd.f32 %v2732_v9, %v506_v5  ;;  %1876 = vmatpush3.bf16.msra.mxu0 %v2225_v27 }
 0x24a   :  { %v534_v54 = vadd.f32 %v2732_v9, %v507_v8  ;;  %v526_v36 = vadd.f32 %v2732_v9, %v499_v10  ;;  %v527_v17 = vadd.f32 %v2732_v9, %v500_v11  ;;  %v528_v42 = vadd.f32 %v2732_v9, %v501_v15 }
 0x24b   :  { %v556_v20 = vmax.f32 %v535_v30, 0.0  ;;  %v557_v21 = vmax.f32 %v536_v32, 0.0  ;;  %v558_v25 = vmax.f32 %v537_v13, 0.0  ;;  %v554_v26 = vmax.f32 %v2755_v48, 0.0 }
 0x24c   :  { %v555_v29 = vmax.f32 %v534_v54, 0.0  ;;  %v547_v33 = vmax.f32 %v526_v36, 0.0  ;;  %v548_v35 = vmax.f32 %v527_v17, 0.0  ;;  %v549_v37 = vmax.f32 %v528_v42, 0.0 }
 0x24d   :  { %v634_v41 = vrot.slane %v556_v20, 4  ;;  %v635_v43 = vrot.slane %v557_v21, 4  ;;  %v2762_v45 = vrot.slane %v558_v25, 4  ;;  %v618_v49 = vrot.slane %v554_v26, 2 }
 0x24e   :  { %v619_v51 = vrot.slane %v555_v29, 2  ;;  %v2766_v53 = vrot.slane %v556_v20, 2  ;;  %v585_v57 = vrot.slane %v547_v33, 4  ;;  %v586_v59 = vrot.slane %v548_v35, 4 }
 0x24f   :  { %v636_v61 = vsel %vm584_vm4, %v634_v41, %v635_v43  ;;  %v638_v6 = vsel %vm584_vm4, %v635_v43, %v2762_v45  ;;  %v2771_v14 = vrot.slane %v549_v37, 4  ;;  %v2774_v23 = vadd.f32 %v2732_v9, %v497_v19 }
 0x250   :  { %v2151_v28 = vpack.i.bf16 %v638_v6, %v636_v61  ;;  %v620_v31 = vsel %vm567_vm5, %v618_v49, %v619_v51  ;;  %v622_v34 = vsel %vm567_vm5, %v619_v51, %v2766_v53  ;;  %v587_v39 = vsel %vm584_vm4, %v585_v57, %v586_v59 }
 0x251   :  { %v2141_v44 = vpack.i.bf16 %v622_v34, %v620_v31  ;;  %v589_v47 = vsel %vm584_vm4, %v586_v59, %v2771_v14  ;;  %v525_v50 = vadd.f32 %v2732_v9, %v498_v0  ;;  %v545_v55 = vmax.f32 %v2774_v23, 0.0 }
 0x252   :  { %2152 = vrot.lane.b32.xlu1 %v2151_v28, %s2309_s14  ;;  %v2156_v60 = vpack.i.bf16 %v589_v47, %v587_v39  ;;  %v571_v3 = vrot.slane %v547_v33, 2  ;;  %v529_v4 = vadd.f32 %v2732_v9, %v502_v7  ;;  %v530_v5 = vadd.f32 %v2732_v9, %v503_v38 }
 0x253   :  { %2142 = vrot.lane.b32.xlu0 %v2141_v44, %s2310_s15  ;;  %v546_v8 = vmax.f32 %v525_v50, 0.0  ;;  %v568_v10 = vrot.slane %v545_v55, 2  ;;  %v601_v11 = vrot.slane %v549_v37, 6  ;;  %v538_v15 = vadd.f32 %v2732_v9, %v511_v40 }
 0x254   :  { %v550_v19 = vmax.f32 %v529_v4, 0.0  ;;  %v551_v0 = vmax.f32 %v530_v5, 0.0  ;;  %v539_v46 = vadd.f32 %v2732_v9, %v512_v18  ;;  %v650_v30 = vrot.slane %v558_v25, 6  ;;  %v2808_v25 = vld [vmem:[%s3090_s5 + $0x80] sm:$0xff]  }
 0x255   :  { %v569_v32 = vrot.slane %v546_v8, 2  ;;  %v559_v13 = vmax.f32 %v538_v15, 0.0  ;;  %v2176_v7 = vpack.i.bf16 %v2771_v14, %v2762_v45  ;;  %v2171_v38 = vpack.i.bf16 %v571_v3, %v2766_v53  ;;  %2009 = vmatprep.subr.bf16.mxu0 %v2808_v25 }
 0x256   :  { %2157 = vrot.lane.b32.xlu1 %v2156_v60, %s2309_s14  ;;  %v602_v54 = vrot.slane %v550_v19, 6  ;;  %v604_v36 = vrot.slane %v551_v0, 6  ;;  %v560_v17 = vmax.f32 %v539_v46, 0.0  ;;  %v504_v40 = vmul.f32 %v2715_v52, %v2547_v56 }
 0x257   :  { %v570_v42 = vsel %vm567_vm5, %v568_v10, %v569_v32  ;;  %v572_v18 = vsel %vm567_vm5, %v569_v32, %v571_v3  ;;  %v651_v20 = vrot.slane %v559_v13, 6  ;;  %v505_v21 = vmul.f32 %v2715_v52, %v2562_v62 }
 0x258   :  { %v2146_v29 = vpack.i.bf16 %v572_v18, %v570_v42  ;;  %v603_v33 = vsel %vm174_vm1, %v601_v11, %v602_v54  ;;  %v605_v35 = vsel %vm174_vm1, %v602_v54, %v604_v36  ;;  %v653_v37 = vrot.slane %v560_v17, 6 }
 0x259   :  { %v2166_v56 = vpack.i.bf16 %v605_v35, %v603_v33  ;;  %v652_v41 = vsel %vm174_vm1, %v650_v30, %v651_v20  ;;  %v531_v43 = vadd.f32 %v2732_v9, %v504_v40  ;;  %v532_v49 = vadd.f32 %v2732_v9, %v505_v21 }
 0x25a   :  { %2147 = vrot.lane.b32.xlu0 %v2146_v29, %s2310_s15  ;;  %v654_v62 = vsel %vm174_vm1, %v651_v20, %v653_v37  ;;  %v2181_v45 = vpack.i.bf16 %v604_v36, %v653_v37  ;;  %v495_v51 = vmul.f32 %v2715_v52, %v2477_v22  ;;  %v496_v57 = vmul.f32 %v2715_v52, %v2479_v24 }
 0x25b   :  { %2167 = vrot.lane.b32.xlu1 %v2166_v56, %s2311_s17  ;;  %v2161_v53 = vpack.i.bf16 %v654_v62, %v652_v41  ;;  %v513_v61 = vmul.f32 %v2715_v52, %v2612_v58  ;;  %v514_v14 = vmul.f32 %v2715_v52, %v2614_v63  ;;  %v515_v27 = vmul.f32 %v2715_v52, %v2628_v12 }
 0x25c   :  { %v522_v59 = vadd.f32 %v2732_v9, %v495_v51  ;;  %v523_v6 = vadd.f32 %v2732_v9, %v496_v57  ;;  %v552_v47 = vmax.f32 %v531_v43, 0.0  ;;  %v553_v50 = vmax.f32 %v532_v49, 0.0 }
 0x25d   :  { %v540_v22 = vadd.f32 %v2732_v9, %v513_v61  ;;  %v541_v24 = vadd.f32 %v2732_v9, %v514_v14  ;;  %v2834_v28 = vadd.f32 %v2732_v9, %v515_v27 }
 0x25e   :  { %2162 = vrot.lane.b32.xlu0 %v2161_v53, %s2311_s17  ;;  %v543_v8 = vmax.f32 %v522_v59, 0.0  ;;  %v544_v10 = vmax.f32 %v523_v6, 0.0 }
 0x25f   :  { %2177 = vrot.lane.b32.xlu1 %v2176_v7, %s2309_s14  ;;  %v561_v31 = vmax.f32 %v540_v22, 0.0  ;;  %v562_v58 = vmax.f32 %v541_v24, 0.0  ;;  %v563_v48 = vmax.f32 %v2834_v28, 0.0 }
 0x261   :  { %v2837_v34 = vpack.c.bf16 %v562_v58, %v561_v31 }
 0x262   :  { %2172 = vrot.lane.b32.xlu0 %v2171_v38, %s2310_s15 }
 0x266   :  { %2182 = vrot.lane.b32.xlu0 %v2181_v45, %s2311_s17  ;;  %v2227_v45 = vld [vmem:[%s3090_s5 + $0x88] sm:$0xff]  }
 0x2c4   :  { %v2153_v63 = vpop.permute.xlu1 %2152 }
 0x2c5   :  { %v2143_v39 = vpop.permute.xlu0 %2142  ;;  %v2155_v15 = vunpack.i.h.bf16 %v2153_v63  ;;  %v2154_v19 = vunpack.i.l.bf16 %v2153_v63 }
 0x2c6   :  { %v2145_v52 = vunpack.i.h.bf16 %v2143_v39  ;;  %v2144_v44 = vunpack.i.l.bf16 %v2143_v39 }
 0x2c8   :  { %v2158_v12 = vpop.permute.xlu1 %2157  ;;  %v676_v30 = vsel %vm664_vm6, %v552_v47, %v2144_v44  ;;  %v677_v32 = vsel %vm664_vm6, %v553_v50, %v2145_v52 }
 0x2c9   :  { %v2160_v60 = vunpack.i.h.bf16 %v2158_v12  ;;  %v2159_v3 = vunpack.i.l.bf16 %v2158_v12  ;;  %v679_v21 = vsel %vm668_vm7, %v676_v30, %v2154_v19  ;;  %v680_v29 = vsel %vm668_vm7, %v677_v32, %v2155_v15  ;;  %v2228_v30 = vld [vmem:[%s3093_s8 + $0x40] sm:$0xff]  }
 0x2ca   :  { %v2230_v32 = vld [vmem:[%s3093_s8 + $0xc0] sm:$0xff]  }
 0x2cc   :  { %v2148_v9 = vpop.permute.xlu0 %2147 }
 0x2cd   :  { %v2150_v4 = vunpack.i.h.bf16 %v2148_v9  ;;  %v2149_v5 = vunpack.i.l.bf16 %v2148_v9  ;;  %v2168_v11 = vpop.permute.xlu1 %2167 }
 0x2ce   :  { %v2170_v0 = vunpack.i.h.bf16 %v2168_v11  ;;  %v2169_v46 = vunpack.i.l.bf16 %v2168_v11 }
 0x2cf   :  { %v665_v13 = vsel %vm664_vm6, %v543_v8, %v2149_v5  ;;  %v666_v7 = vsel %vm664_vm6, %v544_v10, %v2150_v4 }
 0x2d0   :  { %v669_v38 = vsel %vm668_vm7, %v665_v13, %v2159_v3  ;;  %v670_v54 = vsel %vm668_vm7, %v666_v7, %v2160_v60  ;;  %v2163_v36 = vpop.permute.xlu0 %2162  ;;  %v2231_v13 = vld [vmem:[%s3093_s8 + $0x80] sm:$0xff]   ;;  %v2232_v7 = vld [vmem:[%s3093_s8 + $0x48] sm:$0xff]  }
 0x2d1   :  { %v673_v17 = vsel %vm672_vm8, %v669_v38, %v2169_v46  ;;  %v674_v40 = vsel %vm672_vm8, %v670_v54, %v2170_v0  ;;  %v2165_v42 = vunpack.i.h.bf16 %v2163_v36  ;;  %v2164_v18 = vunpack.i.l.bf16 %v2163_v36  ;;  %v2178_v33 = vpop.permute.xlu1 %2177  ;;  %v2234_v38 = vld [vmem:[%s3093_s8 + $0xc8] sm:$0xff]  }
 0x2d2   :  { %v685_v20 = vpack.c.bf16 %v674_v40, %v673_v17  ;;  %v2180_v49 = vunpack.i.h.bf16 %v2178_v33  ;;  %v2179_v51 = vunpack.i.l.bf16 %v2178_v33  ;;  %v2312_v0 = vmov 0.055555556   ;;  %v2233_v54 = vld [vmem:[%s3093_s8 + $0x8] sm:$0xff]   ;;  %v2236_v17 = vld [vmem:[%s3093_s8 + $0x50] sm:$0xff]   ;;  %v2243_v33 = vld [vmem:[%s3093_s8 + $0x98] sm:$0xff]  }
 0x2d3   :  { %v682_v35 = vsel %vm672_vm8, %v679_v21, %v2164_v18  ;;  %v683_v37 = vsel %vm672_vm8, %v680_v29, %v2165_v42  ;;  %v2235_v36 = vld [vmem:[%s3093_s8 + $0x88] sm:$0xff]   ;;  %v2238_v40 = vld [vmem:[%s3093_s8 + $0xd0] sm:$0xff]   ;;  %v2242_v21 = vld [vmem:[%s3093_s8 + $0xd8] sm:$0xff]  }
 0x2d4   :  { %v2173_v56 = vpop.permute.xlu0 %2172  ;;  %v686_v41 = vpack.c.bf16 %v683_v37, %v682_v35  ;;  %v2237_v42 = vld [vmem:[%s3093_s8 + $0x10] sm:$0xff]   ;;  %v2241_v29 = vld [vmem:[%s3093_s8 + $0x18] sm:$0xff]   ;;  %v2244_v35 = vld [vmem:[%s3093_s8 + $0x60] sm:$0xff]  }
 0x2d5   :  { %v2175_v43 = vunpack.i.h.bf16 %v2173_v56  ;;  %v2174_v62 = vunpack.i.l.bf16 %v2173_v56  ;;  %v2239_v18 = vld [vmem:[%s3093_s8 + $0x90] sm:$0xff]   ;;  %v2246_v37 = vld [vmem:[%s3093_s8 + $0xe0] sm:$0xff]  }
 0x2d6   :  { %873 = vmatprep.mubr.bf16.mxu0 %v686_v41  ;;  %v2245_v56 = vld [vmem:[%s3093_s8 + $0x20] sm:$0xff]  }
 0x2d7   :  { %v667_v53 = vsel %vm664_vm6, %v545_v55, %v2175_v43  ;;  %v678_v57 = vsel %vm664_vm6, %v554_v26, %v2174_v62  ;;  %874 = vmatmul.mubr.bf16.vlgmr.msra.gmra.mrb[44].mxu0 %v685_v20  ;;  %v690_v26 = vpack.c.bf16 %v563_v48, %v563_v48  ;;  %v2240_v20 = vld [vmem:[%s3093_s8 + $0x58] sm:$0xff]   ;;  %v2247_v41 = vld [vmem:[%s3093_s8 + $0xa0] sm:$0xff]   ;;  %v2248_v43 = vld [vmem:[%s3093_s8 + $0x68] sm:$0xff]  }
 0x2d8   :  { %v2183_v59 = vpop.permute.xlu0 %2182  ;;  %2010 = vmatpush3.bf16.msra.mxu0 %v2808_v25  ;;  %v681_v14 = vsel %vm668_vm7, %v678_v57, %v2179_v51  ;;  %v671_v27 = vsel %vm668_vm7, %v667_v53, %v2180_v49  ;;  %v2250_v62 = vld [vmem:[%s3093_s8 + $0xe8] sm:$0xff]   ;;  %v2252_v51 = vld [vmem:[%s3093_s8 + $0x70] sm:$0xff]   ;;  %v937_v48 = vld [vmem:[%s3091_s6] sm:$0x1] }
 0x2d9   :  { %v2185_v61 = vunpack.i.h.bf16 %v2183_v59  ;;  %v2184_v6 = vunpack.i.l.bf16 %v2183_v59  ;;  %2011 = vmatprep.subr.bf16.mxu0 %v2227_v45  ;;  %v2251_v49 = vld [vmem:[%s3093_s8 + $0xa8] sm:$0xff]   ;;  %v2254_v53 = vld [vmem:[%s3093_s8 + $0xf0] sm:$0xff]  }
 0x2da   :  { %v2253_v57 = vld [vmem:[%s3093_s8 + $0x30] sm:$0xff]  }
 0x2db   :  { %v684_v22 = vsel %vm672_vm8, %v681_v14, %v2184_v6  ;;  %v675_v23 = vsel %vm672_vm8, %v671_v27, %v2185_v61  ;;  %v2255_v59 = vld [vmem:[%s3093_s8 + $0xb0] sm:$0xff]  }
 0x2dc   :  { %v689_v55 = vpack.c.bf16 %v684_v22, %v684_v22  ;;  %v688_v24 = vpack.c.bf16 %v675_v23, %v675_v23  ;;  %2012 = vmatpush3.bf16.msra.mxu0 %v2227_v45  ;;  %v2249_v45 = vld [vmem:[%s3093_s8 + $0x28] sm:$0xff]  }
 0x2dd   :  { %1901 = vmatprep.subr.bf16.mxu0 %v2228_v30 }
 0x2de   :  { %881 = vmatprep.mubr.bf16.mxu0 %v689_v55 }
 0x2df   :  { %882 = vmatmul.mubr.bf16.gmra.mrb[48].mxu0 %v688_v24 }
 0x2e0   :  { %2013 = vmatprep.mubr.msk.bf16.mxu0 %vm664_vm6, %v2837_v34 }
 0x2e7   :  { %2014 = vmatmul.mubr.msk.bf16.vlgmr.msra.gmra.mrb[52].mxu0 %vm664_vm6, %v690_v26 }
 0x3aa   :  { %v1877_v25 = vpop.f32.mrb[44].mxu0 }
 0x3ab   :  { %v1878_v31 = vpop.f32.mrb[45].mxu0 }
 0x3ac   :  { %v1879_v58 = vadd.f32 %v1878_v31, %v1877_v25  ;;  %v1880_v63 = vpop.f32.mrb[46].mxu0  ;;  %v938_v31 = vld [vmem:[%s3092_s7] sm:$0x1] }
 0x3ad   :  { %v1881_v39 = vpop.f32.mrb[47].mxu0 }
 0x3ae   :  { %v1882_v12 = vadd.f32 %v1881_v39, %v1880_v63 }
 0x3b2   :  { %v1883_v52 = vpop.f32.mrb[48].mxu0 }
 0x3b3   :  { %v1884_v44 = vpop.f32.mrb[49].mxu0 }
 0x3b4   :  { %v1885_v47 = vadd.f32 %v1884_v44, %v1883_v52  ;;  %v1886_v50 = vpop.f32.mrb[50].mxu0 }
 0x3b5   :  { %v1887_v60 = vpop.f32.mrb[51].mxu0  ;;  %v2257_v50 = vld [vmem:[%s3093_s8 + $0x38] sm:$0xff]  }
 0x3b6   :  { %v2258_v60 = vld [vmem:[%s3093_s8 + $0xf8] sm:$0xff]  }
 0x3ba   :  { %v2015_v3 = vpop.f32.mrb[52].mxu0 }
 0x3bb   :  { %v2869_v9 = vadd.f32 %v2015_v3, %v1885_v47  ;;  %v923_v34 = vpop.f32.mrb[53].mxu0  ;;  %v2256_v47 = vld [vmem:[%s3093_s8 + $0x78] sm:$0xff]  }
 0x3bc   :  { %v2871_v4 = vadd.f32 %v1879_v58, %v923_v34  ;;  %v2016_v28 = vpop.f32.mrb[54].mxu0  ;;  %v2259_v34 = vld [vmem:[%s3093_s8 + $0xb8] sm:$0xff]  }
 0x3bd   :  { %v926_v5 = vpop.f32.mrb[55].mxu0  ;;  %v1018_v46 = vmul.f32 %v2869_v9, %v2869_v9 }
 0x3be   :  { %v2873_v8 = vadd.f32 %v1882_v12, %v926_v5  ;;  %v1016_v15 = vmul.f32 %v2871_v4, %v2871_v4 }
 0x3c0   :  { %v2128_v10 = vpack.c.bf16 %v2873_v8, %v2871_v4  ;;  %v1017_v11 = vmul.f32 %v2873_v8, %v2873_v8 }
 0x3c2   :  { %2129 = vmatpush3.bf16.msra.mxu1 %v2128_v10  ;;  %v2131_v19 = vpack.c.bf16 %v1017_v11, %v1016_v15 }
 0x3c3   :  { %2021 = vmatprep.subr.mxu1 %v2306_v1 }
 0x3c6   :  { %2022 = vmatpush3.msk.msra.mxu1 %vm174_vm1, %v2869_v9 }
 0x3c7   :  { %2024 = vmatmul.mubr.msk.f32.vlgmr.msra.gmra.mrb[4].mxu1 %vm939_vm9, %v2312_v0  ;;  %2130 = vmatprep.subr.bf16.mxu1 %v2308_v16  ;;  %v2229_v16 = vld [vmem:[%s3093_s8] sm:$0xff]  }
 0x3c8   :  { %2132 = vmatpush3.bf16.msra.mxu1 %v2131_v19  ;;  %2032 = vmatprep.mubr.msk.f32.mxu1 %vm2307_vm0, %v2306_v1 }
 0x3c9   :  { %2030 = vmatprep.subr.mxu1 %v2306_v1  ;;  %1902 = vmatpush3.bf16.msra.mxu0 %v2229_v16 }
 0x3ca   :  { %1903 = vmatprep.subr.bf16.mxu0 %v2232_v7 }
 0x3cc   :  { %2031 = vmatpush3.msk.msra.mxu1 %vm174_vm1, %v1018_v46 }
 0x3cd   :  { %2033 = vmatmul.mubr.msk.f32.vlgmr.msra.gmra.mrb[6].mxu1 %vm939_vm9, %v2312_v0  ;;  %1923 = vmatprep.subr.bf16.mxu1 %v2230_v32 }
 0x3ce   :  { %1924 = vmatpush3.bf16.msra.mxu1 %v2231_v13  ;;  %1904 = vmatpush3.bf16.msra.mxu0 %v2233_v54 }
 0x3cf   :  { %1925 = vmatprep.subr.bf16.mxu1 %v2234_v38  ;;  %1905 = vmatprep.subr.bf16.mxu0 %v2236_v17 }
 0x3d2   :  { %1926 = vmatpush3.bf16.msra.mxu1 %v2235_v36  ;;  %1906 = vmatpush3.bf16.msra.mxu0 %v2237_v42 }
 0x3d3   :  { %1927 = vmatprep.subr.bf16.mxu1 %v2238_v40  ;;  %1907 = vmatprep.subr.bf16.mxu0 %v2240_v20 }
 0x3d6   :  { %1928 = vmatpush3.bf16.msra.mxu1 %v2239_v18  ;;  %1908 = vmatpush3.bf16.msra.mxu0 %v2241_v29 }
 0x3d7   :  { %1929 = vmatprep.subr.bf16.mxu1 %v2242_v21  ;;  %1909 = vmatprep.subr.bf16.mxu0 %v2244_v35  ;;  %v2260_v35 = vld [vmem:[%s3093_s8 + $0x100] sm:$0xff]  }
 0x3da   :  { %1930 = vmatpush3.bf16.msra.mxu1 %v2243_v33  ;;  %1910 = vmatpush3.bf16.msra.mxu0 %v2245_v56  ;;  %v2262_v56 = vld [vmem:[%s3093_s8 + $0x110] sm:$0xff]  }
 0x3db   :  { %1931 = vmatprep.subr.bf16.mxu1 %v2246_v37  ;;  %1911 = vmatprep.subr.bf16.mxu0 %v2248_v43  ;;  %v2261_v37 = vld [vmem:[%s3093_s8 + $0x108] sm:$0xff]  }
 0x3de   :  { %1932 = vmatpush3.bf16.msra.mxu1 %v2247_v41  ;;  %1912 = vmatpush3.bf16.msra.mxu0 %v2249_v45  ;;  %v2263_v41 = vld [vmem:[%s3093_s8 + $0x118] sm:$0xff]   ;;  %v2264_v45 = vld [vmem:[%s3096_s11] sm:$0xff]  }
 0x3df   :  { %1933 = vmatprep.subr.bf16.mxu1 %v2250_v62  ;;  %1913 = vmatprep.subr.bf16.mxu0 %v2252_v51  ;;  %v2266_v51 = vld [vmem:[%s3096_s11 + $0x10] sm:$0xff]  }
 0x3e2   :  { %1934 = vmatpush3.bf16.msra.mxu1 %v2251_v49  ;;  %1914 = vmatpush3.bf16.msra.mxu0 %v2253_v57  ;;  %v2265_v49 = vld [vmem:[%s3096_s11 + $0x8] sm:$0xff]   ;;  %v2268_v57 = vld [vmem:[%s3096_s11 + $0x20] sm:$0xff]  }
 0x3e3   :  { %1935 = vmatprep.subr.bf16.mxu1 %v2254_v53  ;;  %1915 = vmatprep.subr.bf16.mxu0 %v2256_v47  ;;  %v2267_v53 = vld [vmem:[%s3096_s11 + $0x18] sm:$0xff]  }
 0x3e6   :  { %1936 = vmatpush3.bf16.msra.mxu1 %v2255_v59  ;;  %1916 = vmatpush3.bf16.msra.mxu0 %v2257_v50  ;;  %v2269_v59 = vld [vmem:[%s3096_s11 + $0x28] sm:$0xff]  }
 0x3e7   :  { %1937 = vmatprep.subr.bf16.mxu1 %v2258_v60  ;;  %2035 = vmatprep.subr.bf16.mxu0 %v2306_v1 }
 0x3ea   :  { %1938 = vmatpush3.bf16.msra.mxu1 %v2259_v34 }
 0x3eb   :  { %2047 = vmatprep.subr.bf16.mxu1 %v2306_v1 }
 0x49a   :  { %v1012_v61 = vpop.f32.mrb[4].mxu1 }
 0x49b   :  { %v2025_v6 = vpop.f32.mrb[5].mxu1  ;;  %v1092_v14 = vmul.f32 %v1012_v61, %v1012_v61 }
 0x49c   :  { %v2271_v6 = vld [vmem:[%s3096_s11 + $0x38] sm:$0xff]  }
 0x4a0   :  { %v1088_v27 = vpop.f32.mrb[6].mxu1 }
 0x4a1   :  { %v1093_v22 = vsub.f32 %v1088_v27, %v1092_v14  ;;  %v2034_v23 = vpop.f32.mrb[7].mxu1 }
 0x4a3   :  { %v1094_v55 = vmax.f32 %v1093_v22, 0.0 }
 0x4a5   :  { %v1095_v24 = vadd.f32 1e-05, %v1094_v55 }
 0x4a7   :  { %2274 = vrsqrt.f32 %v1095_v24 }
 0x4b1   :  { %v2275_v26 = vpop.eup %2274 }
 0x4b2   :  { %v1097_v25 = vmul.f32 %v2275_v26, %v937_v48 }
 0x4b4   :  { %v1098_v58 = vmul.f32 %v1097_v25, %v1012_v61  ;;  %v1104_v63 = vrot.slane %v1097_v25, %v2617_v2  ;;  %v2270_v61 = vld [vmem:[%s3096_s11 + $0x30] sm:$0xff]  }
 0x4b6   :  { %v1099_v39 = vsub.f32 %v938_v31, %v1098_v58  ;;  %v1107_v12 = vmul.f32 %v1104_v63, %v2873_v8  ;;  %v1106_v44 = vmul.f32 %v1104_v63, %v2871_v4  ;;  %v1108_v3 = vmul.f32 %v1104_v63, %v2869_v9 }
 0x4b8   :  { %v1113_v52 = vrot.slane %v1099_v39, %v2617_v2 }
 0x4ba   :  { %v1116_v28 = vadd.f32 %v1113_v52, %v1107_v12  ;;  %v1115_v4 = vadd.f32 %v1113_v52, %v1106_v44  ;;  %v1117_v5 = vadd.f32 %v1113_v52, %v1108_v3 }
 0x4bc   :  { %v1119_v8 = vmax.f32 %v1116_v28, 0.0  ;;  %v1118_v10 = vmax.f32 %v1115_v4, 0.0  ;;  %v1120_v43 = vmax.f32 %v1117_v5, 0.0 }
 0x4be   :  { %v1133_v11 = vrot.slane %v1119_v8, 2  ;;  %v1139_v15 = vrot.slane %v1119_v8, 6  ;;  %v1122_v9 = vrot.slane %v1118_v10, 2  ;;  %v1128_v19 = vrot.slane %v1118_v10, 6 }
 0x4bf   :  { %v1126_v32 = vrot.slane %v1118_v10, 4  ;;  %v1137_v13 = vrot.slane %v1119_v8, 4  ;;  %v1151_v62 = vpack.c.bf16 %v1120_v43, %v1120_v43 }
 0x4c0   :  { %v2191_v0 = vpack.i.bf16 %v1133_v11, %v1139_v15  ;;  %v2186_v46 = vpack.i.bf16 %v1122_v9, %v1128_v19 }
 0x4c2   :  { %2192 = vrot.lane.b32.xlu0 %v2191_v0, %s2309_s14  ;;  %2187 = vrot.lane.b32.xlu1 %v2186_v46, %s2309_s14 }
 0x534   :  { %v2193_v30 = vpop.permute.xlu0 %2192  ;;  %v2188_v16 = vpop.permute.xlu1 %2187 }
 0x535   :  { %v2195_v7 = vunpack.i.h.bf16 %v2193_v30  ;;  %v2194_v38 = vunpack.i.l.bf16 %v2193_v30  ;;  %v2190_v54 = vunpack.i.h.bf16 %v2188_v16  ;;  %v2189_v36 = vunpack.i.l.bf16 %v2188_v16 }
 0x537   :  { %v1145_v17 = vsel %vm668_vm7, %v1119_v8, %v2195_v7  ;;  %v1143_v40 = vsel %vm668_vm7, %v1118_v10, %v2190_v54  ;;  %v1144_v42 = vsel %vm668_vm7, %v1126_v32, %v2189_v36  ;;  %v1146_v18 = vsel %vm668_vm7, %v1137_v13, %v2194_v38  ;;  %v1563_v7 = vld [vmem:[%s3094_s9] sm:$0x1]  ;;  %s2313_s9 = smov [#allocation2]  }
 0x538   :  { %v1149_v20 = vpack.c.bf16 %v1145_v17, %v1145_v17  ;;  %v1147_v21 = vpack.c.bf16 %v1143_v40, %v1143_v40  ;;  %v1148_v29 = vpack.c.bf16 %v1144_v42, %v1144_v42  ;;  %v1150_v33 = vpack.c.bf16 %v1146_v18, %v1146_v18  ;;  %v1564_v36 = vld [vmem:[%s3095_s10] sm:$0x1]  ;;  %s1740_s10 = sshll.u32 %s2313_s9, 4  ;;  %s1741_s10 = int_to_ptr.vmem [resolvable:$true] %s1740_s10 }
 0x539   :  { %p2287_p1 = scmp.lt.s32.totalorder %s1741_s10, %s1741_s10 }
 0x53a   :  { %1475 = vmatprep.mubr.bf16.mxu0 %v1148_v29  ;;  %1515 = vmatprep.mubr.bf16.mxu1 %v1150_v33 }
 0x53b   :  { %1476 = vmatmul.mubr.bf16.vlgmr.msra.gmra.mrb[56].mxu0 %v1147_v21  ;;  %1516 = vmatmul.mubr.bf16.vlgmr.msra.gmra.mrb[8].mxu1 %v1149_v20 }
 0x53c   :  { %2036 = vmatpush3.bf16.msra.mxu0 %v2260_v35  ;;  %2043 = vmatprep.mubr.msk.bf16.mxu0 %vm2307_vm0, %v2306_v1  ;;  %v1838_v35 = vld [vmem:[%s3097_s12] ss:$0 sm:$0xff]  ;;  %s2282_s12 = scalar_lea.vmem %s1741_s10, 32 }
 0x53d   :  { %2037 = vmatprep.subr.bf16.mxu0 %v2306_v1  ;;  %2063 = vmatprep.mubr.msk.bf16.mxu1 %vm2307_vm0, %v2306_v1  ;;  %p2283_p0 = scmp.ne.s32.totalorder %s1741_s10, %s2282_s12  ;;  %p2288_p2 = scmp.lt.s32.totalorder %s2282_s12, %s2282_s12 }
 0x53e   :  { %2048 = vmatpush3.bf16.msra.mxu1 %v2264_v45 }
 0x53f   :  { %2049 = vmatprep.subr.bf16.mxu1 %v2306_v1  ;;  %p2289_p3 = por %p2288_p2, %p2287_p1 }
 0x540   :  { %2038 = vmatpush3.bf16.msra.mxu0 %v2261_v37 }
 0x541   :  { %2039 = vmatprep.subr.bf16.mxu0 %v2306_v1  ;;  %p2290_p4 = pnand %p2289_p3, %p2283_p0 }
 0x542   :  { %2050 = vmatpush3.bf16.msra.mxu1 %v2265_v49 }
 0x543   :  { %2051 = vmatprep.subr.bf16.mxu1 %v2306_v1 }
 0x544   :  { %2040 = vmatpush3.bf16.msra.mxu0 %v2262_v56 }
 0x545   :  { %2041 = vmatprep.subr.bf16.mxu0 %v2306_v1 }
 0x546   :  { %2052 = vmatpush3.bf16.msra.mxu1 %v2266_v51 }
 0x547   :  { %2053 = vmatprep.subr.bf16.mxu1 %v2306_v1 }
 0x548   :  { %2042 = vmatpush3.bf16.msra.mxu0 %v2263_v41 }
 0x54a   :  { %2054 = vmatpush3.bf16.msra.mxu1 %v2267_v53 }
 0x54b   :  { %2044 = vmatmul.mubr.msk.bf16.vlgmr.msra.gmra.mrb[60].mxu0 %vm668_vm7, %v1151_v62  ;;  %2055 = vmatprep.subr.bf16.mxu1 %v2306_v1 }
 0x54e   :  { %2056 = vmatpush3.bf16.msra.mxu1 %v2268_v57 }
 0x54f   :  { %2057 = vmatprep.subr.bf16.mxu1 %v2306_v1 }
 0x552   :  { %2058 = vmatpush3.bf16.msra.mxu1 %v2269_v59 }
 0x553   :  { %2059 = vmatprep.subr.bf16.mxu1 %v2306_v1 }
 0x556   :  { %2060 = vmatpush3.bf16.msra.mxu1 %v2270_v61 }
 0x557   :  { %2061 = vmatprep.subr.bf16.mxu1 %v2306_v1 }
 0x55a   :  { %2062 = vmatpush3.bf16.msra.mxu1 %v2271_v6 }
 0x60e   :  { %v1917_v14 = vpop.f32.mrb[56].mxu0  ;;  %v1939_v27 = vpop.f32.mrb[8].mxu1 }
 0x60f   :  { %v1918_v22 = vpop.f32.mrb[57].mxu0  ;;  %v1940_v23 = vpop.f32.mrb[9].mxu1 }
 0x610   :  { %v1919_v55 = vadd.f32 %v1918_v22, %v1917_v14  ;;  %v1941_v24 = vadd.f32 %v1940_v23, %v1939_v27  ;;  %v1920_v48 = vpop.f32.mrb[58].mxu0  ;;  %v1942_v26 = vpop.f32.mrb[10].mxu1 }
 0x611   :  { %v1921_v25 = vpop.f32.mrb[59].mxu0  ;;  %v1943_v31 = vpop.f32.mrb[11].mxu1 }
 0x612   :  { %v1518_v58 = vadd.f32 %v1941_v24, %v1919_v55 }
 0x61e   :  { %v1557_v63 = vpop.f32.mrb[60].mxu0 }
 0x61f   :  { %v1558_v39 = vadd.f32 %v1557_v63, %v1518_v58  ;;  %v2045_v12 = vpop.f32.mrb[61].mxu0 }
 0x620   :  { %v1560_v52 = vpop.f32.mrb[62].mxu0 }
 0x621   :  { %v1565_v44 = vsel %vm174_vm1, %v1558_v39, 0.0  ;;  %v1574_v47 = vmul.f32 %v1558_v39, %v1558_v39  ;;  %v2046_v1 = vpop.f32.mrb[63].mxu0 }
 0x622   :  { %v1566_v50 = vrot.slane %v1565_v44, 4 }
 0x623   :  { %v1575_v60 = vsel %vm174_vm1, %v1574_v47, 0.0 }
 0x624   :  { %v1567_v3 = vadd.f32 %v1566_v50, %v1565_v44  ;;  %v1576_v34 = vrot.slane %v1575_v60, 4 }
 0x626   :  { %v1568_v28 = vrot.slane %v1567_v3, 2  ;;  %v1577_v4 = vadd.f32 %v1576_v34, %v1575_v60 }
 0x628   :  { %v1569_v5 = vadd.f32 %v1568_v28, %v1567_v3  ;;  %v1578_v8 = vrot.slane %v1577_v4, 2 }
 0x62a   :  { %v1570_v10 = vrot.slane %v1569_v5, 1  ;;  %v1579_v11 = vadd.f32 %v1578_v8, %v1577_v4 }
 0x62c   :  { %v1571_v15 = vadd.f32 %v1570_v10, %v1569_v5  ;;  %v1580_v9 = vrot.slane %v1579_v11, 1 }
 0x62e   :  { %v1573_v19 = vmul.f32 0.5, %v1571_v15  ;;  %v1581_v0 = vadd.f32 %v1580_v9, %v1579_v11 }
 0x630   :  { %v1582_v46 = vmul.f32 0.5, %v1581_v0  ;;  %v1583_v30 = vmul.f32 %v1573_v19, %v1573_v19 }
 0x632   :  { %v1584_v16 = vsub.f32 %v1582_v46, %v1583_v30 }
 0x634   :  { %v1585_v32 = vmax.f32 %v1584_v16, 0.0 }
 0x636   :  { %v1586_v13 = vadd.f32 1e-05, %v1585_v32 }
 0x638   :  { %2276 = vrsqrt.f32 %v1586_v13 }
 0x642   :  { %v2277_v38 = vpop.eup %2276 }
 0x643   :  { %v1588_v54 = vmul.f32 %v2277_v38, %v1563_v7 }
 0x645   :  { %v1589_v17 = vmul.f32 %v1588_v54, %v1573_v19  ;;  %v1595_v40 = vrot.slane %v1588_v54, %v2617_v2 }
 0x647   :  { %v1590_v42 = vsub.f32 %v1564_v36, %v1589_v17  ;;  %v1597_v18 = vmul.f32 %v1595_v40, %v1558_v39 }
 0x649   :  { %v1602_v20 = vrot.slane %v1590_v42, %v2617_v2 }
 0x64b   :  { %v1604_v21 = vadd.f32 %v1602_v20, %v1597_v18 }
 0x64d   :  { %v1605_v29 = vmax.f32 %v1604_v21, 0.0 }
 0x64f   :  { %v1606_v33 = vpack.c.bf16 %v1605_v29, %v1605_v29 }
 0x651   :  { %2064 = vmatmul.mubr.bf16.vlgmr.msra.gmra.mrb[12].mxu1 %v1606_v33 }
 0x724   :  { %v1712_v37 = vpop.f32.mrb[12].mxu1 }
 0x725   :  { %v1713_v56 = vadd.f32 %v1838_v35, %v1712_v37  ;;  %v2065_v41 = vpop.f32.mrb[13].mxu1 }
 0x726   :  { %v1715_v43 = vpop.f32.mrb[14].mxu1 }
 0x727   :  { %v1718_v62 = vmax.f32 %v1713_v56, 0.0  ;;  %v2066_v45 = vpop.f32.mrb[15].mxu1 }
 0x729   :  { %v1720_v49 = vsel %vm1719_vm10, %v1718_v62, -inf }
 0x72a   :  { %1721 = vmax.xlane.f32.xlu1 %v1720_v49 }
 0x7b7   :  { %v1722_v51 = vpop.xlane.xlu1 %1721 }
 0x7b8   :  { %v1723_v2 = vsub.f32 %v1718_v62, %v1722_v51 }
 0x7ba   :  { %v1724_v53 = vmul.f32 1.442695, %v1723_v2 }
 0x7bc   :  { %2278 = vpow2.f32 %v1724_v53 }
 0x7c6   :  { %v2279_v57 = vpop.eup %2278 }
 0x7c7   :  { %v1726_v59 = vsel %vm1719_vm10, %v2279_v57, 0.0 }
 0x7c8   :  { %1727 = vadd.xlane.f32.xlu0 %v1726_v59 }
 0x855   :  { %v1728_v61 = vpop.xlane.xlu0 %1727 }
 0x856   :  { %2280 = vlog2.f32 %v1728_v61 }
 0x860   :  { %v2281_v6 = vpop.eup %2280 }
 0x861   :  { %v1730_v14 = vmul.f32 0.6931472, %v2281_v6 }
 0x863   :  { %v1731_v27 = vadd.f32 %v1730_v14, %v1722_v51 }
 0x865   :  { %v1732_v22 = vsub.f32 %v1718_v62, %v1731_v27 }
 0x867   :  { %1733 = vst.msk [vmem:[#allocation2] sm:$0x3] %vm1719_vm10, %v1732_v22 }
 0x868   :  { %2293 = shalt.err (!%p2290_p4)
}
 0x869   :  { %s2294_s21 = scalar_lea.hbm %s3098_s13, 32 }
 0x86a   :  { %p2295_p5 = scmp.ne.s32.totalorder %s3098_s13, %s2294_s21  ;;  %p2298_p6 = scmp.lt.u32.totalorder %s2294_s21, %s3098_s13 }
 0x86c   :  { %p2300_p7 = pnand %p2298_p6, %p2295_p5 }
 0x86e   :  { %2303 = shalt.err (!%p2300_p7)
}
 0x86f   :  { %1743 = dma.vmem_to_hbm [thread:$0]  %s1741_s10, 32, %s3098_s13, [#allocation3]  }
 0x870   :  { %2304 = dma.done.wait [#allocation3], 32  }
 0x871   :  { %2305 = vsyncadd [#allocation3], 4294967264 }
 0x872   :  { %1747 = vsyncpa [#allocation3], 1 }

</bundles_post_ra>
